<compile_context>
chip_gen: v6e
topology: v6e:2x2x1
jax: 0.10.0
libtpu: 0.0.40
codegen_flags: <defaults>
</compile_context>

<pallas_src>
import functools

import jax
import jax.numpy as jnp
from jax import lax
from jax.experimental import pallas as pl
from jax.experimental.pallas import tpu as pltpu


def _round_up(x, m):
    return ((x + m - 1) // m) * m


# ----------------------------------------------------------------------------
# Pallas kernel: TB GRU time steps per grid iteration.
#   gx_ref : (TB, Bdp, 3*Hp) f32  precomputed x @ W_ih + b_ih (gates r|z|n)
#   whh_ref: (Hp, 3*Hp)      bf16 packed hidden->gate weights
#   bhh_ref: (1, 3*Hp)       f32  packed hidden biases
#   out_ref: (TB, Bdp, Hp)   f32  per-step hidden outputs
#   h_ref  : (Bdp, Hp)       f32  scratch; persists across the sequential grid
# ----------------------------------------------------------------------------
def _gru_seq_kernel(gx_ref, whh_ref, bhh_ref, out_ref, h_ref, *, tb, hp):
    @pl.when(pl.program_id(0) == 0)
    def _():
        h_ref[...] = jnp.zeros_like(h_ref)      # zero initial hidden state

    whh = whh_ref[...]                          # load weights once per block
    bhh = bhh_ref[...]

    def step(t, carry):
        h = h_ref[...]                                       # (Bdp, Hp) f32
        gh = jnp.dot(h.astype(whh.dtype), whh,
                     preferred_element_type=jnp.float32) + bhh   # (Bdp, 3Hp)
        gx = gx_ref[t].astype(jnp.float32)                       # (Bdp, 3Hp)
        r = jax.nn.sigmoid(gx[:, :hp] + gh[:, :hp])
        z = jax.nn.sigmoid(gx[:, hp:2 * hp] + gh[:, hp:2 * hp])
        n = jnp.tanh(gx[:, 2 * hp:] + r * gh[:, 2 * hp:])
        h_new = (1.0 - z) * n + z * h
        h_ref[...] = h_new
        out_ref[t] = h_new
        return carry

    lax.fori_loop(0, tb, step, None, unroll=True)


def run_gru_layer(gx, whh, bhh, hp, *, tb_max=16):
    """gx: (T, Bd, 3*Hp) f32 time-major precomputed input gates.
    Returns (T, Bd, Hp) f32 GRU outputs with zero initial hidden state."""
    T, Bd, G3 = gx.shape
    assert G3 == 3 * hp

    bdp = _round_up(Bd, 8)          # full sublanes
    tb = min(tb_max, T)             # time steps per grid iteration
    tp = _round_up(T, tb)

    gx_p = jnp.zeros((tp, bdp, 3 * hp), jnp.float32)
    gx_p = gx_p.at[:T, :Bd].set(gx)

    kernel = functools.partial(_gru_seq_kernel, tb=tb, hp=hp)
    out = pl.pallas_call(
        kernel,
        out_shape=jax.ShapeDtypeStruct((tp, bdp, hp), jnp.float32),
        grid_spec=pltpu.PrefetchScalarGridSpec(
            num_scalar_prefetch=0,
            grid=(tp // tb,),
            in_specs=[
                pl.BlockSpec((tb, bdp, 3 * hp), lambda i: (i, 0, 0)),
                pl.BlockSpec((hp, 3 * hp), lambda i: (0, 0)),
                pl.BlockSpec((1, 3 * hp), lambda i: (0, 0)),
            ],
            out_specs=pl.BlockSpec((tb, bdp, hp), lambda i: (i, 0, 0)),
            scratch_shapes=[pltpu.VMEM((bdp, hp), jnp.float32)],
        ),
        compiler_params=pltpu.CompilerParams(
            dimension_semantics=("arbitrary",)),   # recurrence => sequential
    )(gx_p, whh, bhh)
    return out[:T, :Bd]


# ----------------------------------------------------------------------------
# DRNN glue: pad -> dilate (reshape) -> hoisted input projection -> recurrent
# Pallas kernel -> un-dilate (reshape) -> unpad, per layer.
# ----------------------------------------------------------------------------
def drnn_forward(x_btd, layers, hp):
    B, T, _ = x_btd.shape
    x = jnp.transpose(x_btd, (1, 0, 2))            # (T, B, F) time-major
    for i, p in enumerate(layers):
        rate = 2 ** i
        n_steps = x.shape[0]
        dil_steps = -(-n_steps // rate)
        pad = dil_steps * rate - n_steps
        if pad:
            x = jnp.concatenate(
                [x, jnp.zeros((pad,) + x.shape[1:], x.dtype)], axis=0)
        F = x.shape[-1]
        # Dilation is a pure reshape: batch block j holds times j, j+rate, ...
        dilated = x.reshape(dil_steps, rate * B, F)
        # Hoisted input projection: one large MXU matmul (bf16 in, f32 acc),
        # covers all time steps at once; b_ih folded in here.
        gx = jnp.dot(dilated.reshape(-1, F).astype(jnp.bfloat16), p["w_ih"],
                     preferred_element_type=jnp.float32)
        gx = gx.reshape(dil_steps, rate * B, 3 * hp) + p["b_ih"]
        dil_out = run_gru_layer(gx, p["w_hh"], p["b_hh"], hp)
        # Un-dilate (pure reshape, matches reference _split_outputs) + unpad.
        # TODO(synk): fold this interleave into the next layer's index_map to
        # avoid one HBM round-trip per layer.
        x = dil_out.reshape(dil_steps * rate, B, hp)[:n_steps]
    return jnp.transpose(x, (1, 0, 2))             # (B, T, Hp)


def encoder_drnn_forward(text_inputs, emb, layers, hp, out_h):
    x_input = jnp.take(emb, text_inputs, axis=0)   # embedding lookup (B,T,D)
    len_seq_sent = jnp.sign(text_inputs).sum(axis=1)
    # NOTE: the PyTorch module sorts rows by length, runs the DRNN, then
    # un-sorts.  No packing is used and every row starts from h0 = 0, so the
    # sort+unsort is a mathematical no-op and is skipped.
    out = drnn_forward(x_input, layers, hp)[:, :, :out_h]     # (B, T, H)
    mask = jnp.sign(len_seq_sent).astype(jnp.float32).reshape(-1, 1, 1)
    return out * mask


# ----------------------------------------------------------------------------
# Deterministic parameter init (PyTorch nn.GRU-style uniform(-1/sqrt(H), ..)),
# packed into fused/lane-padded layouts:  W_ih (Din, 3*Hp), W_hh (Hp, 3*Hp).
# ----------------------------------------------------------------------------
def init_params(key, vocab, D, H, n_layers):
    hp = _round_up(H, 128)
    keys = jax.random.split(key, 1 + n_layers)
    emb = jax.random.normal(keys[0], (vocab, D), jnp.float32) * 0.1
    layers = []
    k = 1.0 / (H ** 0.5)
    for i in range(n_layers):
        d_real = D if i == 0 else H      # true GRU input size per layer
        d_pad = D if i == 0 else hp      # layer>0 consumes padded activations
        lk = jax.random.split(keys[1 + i], 4)
        w_ih = jax.random.uniform(lk[0], (3 * H, d_real), jnp.float32, -k, k)
        w_hh = jax.random.uniform(lk[1], (3 * H, H), jnp.float32, -k, k)
        b_ih = jax.random.uniform(lk[2], (3 * H,), jnp.float32, -k, k)
        b_hh = jax.random.uniform(lk[3], (3 * H,), jnp.float32, -k, k)

        w_ih_p = jnp.zeros((d_pad, 3 * hp), jnp.float32)
        w_hh_p = jnp.zeros((hp, 3 * hp), jnp.float32)
        b_ih_p = jnp.zeros((3 * hp,), jnp.float32)
        b_hh_p = jnp.zeros((1, 3 * hp), jnp.float32)
        for g in range(3):               # r | z | n, each in its own Hp slot
            w_ih_p = w_ih_p.at[:d_real, g * hp:g * hp + H].set(
                w_ih[g * H:(g + 1) * H].T)
            w_hh_p = w_hh_p.at[:H, g * hp:g * hp + H].set(
                w_hh[g * H:(g + 1) * H].T)
            b_ih_p = b_ih_p.at[g * hp:g * hp + H].set(b_ih[g * H:(g + 1) * H])
            b_hh_p = b_hh_p.at[0, g * hp:g * hp + H].set(b_hh[g * H:(g + 1) * H])

        layers.append(dict(
            w_ih=w_ih_p.astype(jnp.bfloat16),   # bf16 weights, f32 accumulate
            w_hh=w_hh_p.astype(jnp.bfloat16),
            b_ih=b_ih_p,
            b_hh=b_hh_p,
        ))
    return emb, layers, hp


if __name__ == "__main__":
    key = jax.random.PRNGKey(0)
    B, T, D, H, L, V = 3, 8, 16, 32, 2, 50   # batch, seq, embed, hidden, drnn layers, vocab
    k_emb, k_tok = jax.random.split(key)
    emb, layers, hp = init_params(k_emb, V, D, H, L)

    toks = jax.random.randint(k_tok, (B, T), 1, V, dtype=jnp.int32)
    toks = toks.at[1, 5:].set(0)   # partially padded sentence (length > 0)
    toks = toks.at[2, :].set(0)    # empty sentence -> zeroed by sentence mask

    fwd = jax.jit(functools.partial(encoder_drnn_forward, emb=emb,
                                    layers=layers, hp=hp, out_h=H))
    out = jax.block_until_ready(fwd(toks))

    assert out.shape == (B, T, H)
    assert bool(jnp.all(out[2] == 0.0))      # empty sentence fully masked
    assert bool(jnp.all(jnp.isfinite(out)))
    print("KERNEL_OK")
</pallas_src>

<mosaic_0001>
module attributes {stable_mosaic.version = 11 : i64} {
  func.func @_gru_seq_kernel(%arg0: i32, %arg1: memref<4x8x384xf32, #tpu.memory_space<vmem>>, %arg2: memref<128x384xbf16, #tpu.memory_space<vmem>>, %arg3: memref<1x384xf32, #tpu.memory_space<vmem>>, %arg4: memref<4x8x128xf32, #tpu.memory_space<vmem>>, %arg5: memref<8x128xf32, #tpu.memory_space<vmem>>) attributes {dimension_semantics = [#tpu.dimension_semantics<arbitrary>], iteration_bounds = array<i64: 1>, scalar_prefetch = 0 : i64, scratch_operands = 1 : i64, tpu.core_type = #tpu.core_type<tc>, window_params = [{transform_indices = @transform_0, window_bounds = array<i64: 4, 8, 384>}, {pipeline_mode = #tpu.pipeline_mode<synchronous>, transform_indices = @transform_1, window_bounds = array<i64: 128, 384>}, {pipeline_mode = #tpu.pipeline_mode<synchronous>, transform_indices = @transform_2, window_bounds = array<i64: 1, 384>}, {transform_indices = @transform_3, window_bounds = array<i64: 4, 8, 128>}]} {
    %c0_i32 = arith.constant 0 : i32
    %0 = arith.cmpi eq, %arg0, %c0_i32 : i32
    %1 = arith.extui %0 : i1 to i32
    %c0_i32_0 = arith.constant 0 : i32
    %2 = arith.cmpi ne, %1, %c0_i32_0 : i32
    scf.if %2 {
      %cst_52 = arith.constant 0.000000e+00 : f32
      %161 = vector.broadcast %cst_52 : f32 to vector<8x128xf32>
      %c0_53 = arith.constant 0 : index
      %c0_54 = arith.constant 0 : index
      %162 = vector.load %arg5[%c0_53, %c0_54] : memref<8x128xf32, #tpu.memory_space<vmem>>, vector<8x128xf32>
      tpu.vector_store %arg5[%c0_53, %c0_54], %161 {strides = array<i32>} : memref<8x128xf32, #tpu.memory_space<vmem>>, vector<8x128xf32>,
    } else {
    }
    %c0 = arith.constant 0 : index
    %c0_1 = arith.constant 0 : index
    %3 = vector.load %arg2[%c0, %c0_1] : memref<128x384xbf16, #tpu.memory_space<vmem>>, vector<128x384xbf16>
    %c0_2 = arith.constant 0 : index
    %c0_3 = arith.constant 0 : index
    %4 = vector.load %arg3[%c0_2, %c0_3] : memref<1x384xf32, #tpu.memory_space<vmem>>, vector<1x384xf32>
    %c0_i32_4 = arith.constant 0 : i32
    %c0_5 = arith.constant 0 : index
    %c0_6 = arith.constant 0 : index
    %5 = vector.load %arg5[%c0_5, %c0_6] : memref<8x128xf32, #tpu.memory_space<vmem>>, vector<8x128xf32>
    %6 = arith.truncf %5 : vector<8x128xf32> to vector<8x128xbf16>
    %cst = arith.constant dense<0.000000e+00> : vector<8x384xf32>
    %7 = tpu.matmul %6, %3, %cst {dimension_numbers = #tpu.dot_dimension_numbers<[1], [0], [0], [1], [0, 0, 1, 1], [], []>} : vector<8x128xbf16>, vector<128x384xbf16>, vector<8x384xf32> -> vector<8x384xf32>
    %8 = vector.broadcast %4 : vector<1x384xf32> to vector<8x384xf32>
    %9 = arith.addf %7, %8 : vector<8x384xf32>
    %10 = arith.index_cast %c0_i32_4 : i32 to index
    %c0_7 = arith.constant 0 : index
    %c0_8 = arith.constant 0 : index
    %11 = vector.load %arg1[%10, %c0_7, %c0_8] : memref<4x8x384xf32, #tpu.memory_space<vmem>>, vector<1x8x384xf32>
    %12 = vector.shape_cast %11 : vector<1x8x384xf32> to vector<8x384xf32>
    %13 = vector.extract_strided_slice %12 {offsets = [0, 0], sizes = [8, 128], strides = [1, 1]} : vector<8x384xf32> to vector<8x128xf32>
    %14 = vector.extract_strided_slice %9 {offsets = [0, 0], sizes = [8, 128], strides = [1, 1]} : vector<8x384xf32> to vector<8x128xf32>
    %15 = arith.addf %13, %14 : vector<8x128xf32>
    %16 = arith.negf %15 : vector<8x128xf32>
    %17 = math.exp %16 : vector<8x128xf32>
    %cst_9 = arith.constant 1.000000e+00 : f32
    %18 = vector.broadcast %cst_9 : f32 to vector<8x128xf32>
    %19 = arith.addf %18, %17 : vector<8x128xf32>
    %20 = arith.divf %18, %19 : vector<8x128xf32>
    %21 = vector.extract_strided_slice %12 {offsets = [0, 128], sizes = [8, 128], strides = [1, 1]} : vector<8x384xf32> to vector<8x128xf32>
    %22 = vector.extract_strided_slice %9 {offsets = [0, 128], sizes = [8, 128], strides = [1, 1]} : vector<8x384xf32> to vector<8x128xf32>
    %23 = arith.addf %21, %22 : vector<8x128xf32>
    %24 = arith.negf %23 : vector<8x128xf32>
    %25 = math.exp %24 : vector<8x128xf32>
    %cst_10 = arith.constant 1.000000e+00 : f32
    %26 = vector.broadcast %cst_10 : f32 to vector<8x128xf32>
    %27 = arith.addf %26, %25 : vector<8x128xf32>
    %28 = arith.divf %26, %27 : vector<8x128xf32>
    %29 = vector.extract_strided_slice %12 {offsets = [0, 256], sizes = [8, 128], strides = [1, 1]} : vector<8x384xf32> to vector<8x128xf32>
    %30 = vector.extract_strided_slice %9 {offsets = [0, 256], sizes = [8, 128], strides = [1, 1]} : vector<8x384xf32> to vector<8x128xf32>
    %31 = arith.mulf %20, %30 : vector<8x128xf32>
    %32 = arith.addf %29, %31 : vector<8x128xf32>
    %33 = math.tanh %32 : vector<8x128xf32>
    %cst_11 = arith.constant 1.000000e+00 : f32
    %34 = vector.broadcast %cst_11 : f32 to vector<8x128xf32>
    %35 = arith.subf %34, %28 : vector<8x128xf32>
    %36 = arith.mulf %35, %33 : vector<8x128xf32>
    %37 = arith.mulf %28, %5 : vector<8x128xf32>
    %38 = arith.addf %36, %37 : vector<8x128xf32>
    %c0_12 = arith.constant 0 : index
    %c0_13 = arith.constant 0 : index
    %39 = vector.load %arg5[%c0_12, %c0_13] : memref<8x128xf32, #tpu.memory_space<vmem>>, vector<8x128xf32>
    tpu.vector_store %arg5[%c0_12, %c0_13], %38 {strides = array<i32>} : memref<8x128xf32, #tpu.memory_space<vmem>>, vector<8x128xf32>,
    %40 = arith.index_cast %c0_i32_4 : i32 to index
    %c0_14 = arith.constant 0 : index
    %c0_15 = arith.constant 0 : index
    %41 = vector.load %arg4[%40, %c0_14, %c0_15] : memref<4x8x128xf32, #tpu.memory_space<vmem>>, vector<1x8x128xf32>
    %42 = vector.shape_cast %41 : vector<1x8x128xf32> to vector<8x128xf32>
    %43 = vector.shape_cast %38 : vector<8x128xf32> to vector<1x8x128xf32>
    tpu.vector_store %arg4[%40, %c0_14, %c0_15], %43 {strides = array<i32>} : memref<4x8x128xf32, #tpu.memory_space<vmem>>, vector<1x8x128xf32>,
    %c1_i32 = arith.constant 1 : i32
    %c0_16 = arith.constant 0 : index
    %c0_17 = arith.constant 0 : index
    %44 = vector.load %arg5[%c0_16, %c0_17] : memref<8x128xf32, #tpu.memory_space<vmem>>, vector<8x128xf32>
    %45 = arith.truncf %44 : vector<8x128xf32> to vector<8x128xbf16>
    %cst_18 = arith.constant dense<0.000000e+00> : vector<8x384xf32>
    %46 = tpu.matmul %45, %3, %cst_18 {dimension_numbers = #tpu.dot_dimension_numbers<[1], [0], [0], [1], [0, 0, 1, 1], [], []>} : vector<8x128xbf16>, vector<128x384xbf16>, vector<8x384xf32> -> vector<8x384xf32>
    %47 = vector.broadcast %4 : vector<1x384xf32> to vector<8x384xf32>
    %48 = arith.addf %46, %47 : vector<8x384xf32>
    %49 = arith.index_cast %c1_i32 : i32 to index
    %c0_19 = arith.constant 0 : index
    %c0_20 = arith.constant 0 : index
    %50 = vector.load %arg1[%49, %c0_19, %c0_20] : memref<4x8x384xf32, #tpu.memory_space<vmem>>, vector<1x8x384xf32>
    %51 = vector.shape_cast %50 : vector<1x8x384xf32> to vector<8x384xf32>
    %52 = vector.extract_strided_slice %51 {offsets = [0, 0], sizes = [8, 128], strides = [1, 1]} : vector<8x384xf32> to vector<8x128xf32>
    %53 = vector.extract_strided_slice %48 {offsets = [0, 0], sizes = [8, 128], strides = [1, 1]} : vector<8x384xf32> to vector<8x128xf32>
    %54 = arith.addf %52, %53 : vector<8x128xf32>
    %55 = arith.negf %54 : vector<8x128xf32>
    %56 = math.exp %55 : vector<8x128xf32>
    %cst_21 = arith.constant 1.000000e+00 : f32
    %57 = vector.broadcast %cst_21 : f32 to vector<8x128xf32>
    %58 = arith.addf %57, %56 : vector<8x128xf32>
    %59 = arith.divf %57, %58 : vector<8x128xf32>
    %60 = vector.extract_strided_slice %51 {offsets = [0, 128], sizes = [8, 128], strides = [1, 1]} : vector<8x384xf32> to vector<8x128xf32>
    %61 = vector.extract_strided_slice %48 {offsets = [0, 128], sizes = [8, 128], strides = [1, 1]} : vector<8x384xf32> to vector<8x128xf32>
    %62 = arith.addf %60, %61 : vector<8x128xf32>
    %63 = arith.negf %62 : vector<8x128xf32>
    %64 = math.exp %63 : vector<8x128xf32>
    %cst_22 = arith.constant 1.000000e+00 : f32
    %65 = vector.broadcast %cst_22 : f32 to vector<8x128xf32>
    %66 = arith.addf %65, %64 : vector<8x128xf32>
    %67 = arith.divf %65, %66 : vector<8x128xf32>
    %68 = vector.extract_strided_slice %51 {offsets = [0, 256], sizes = [8, 128], strides = [1, 1]} : vector<8x384xf32> to vector<8x128xf32>
    %69 = vector.extract_strided_slice %48 {offsets = [0, 256], sizes = [8, 128], strides = [1, 1]} : vector<8x384xf32> to vector<8x128xf32>
    %70 = arith.mulf %59, %69 : vector<8x128xf32>
    %71 = arith.addf %68, %70 : vector<8x128xf32>
    %72 = math.tanh %71 : vector<8x128xf32>
    %cst_23 = arith.constant 1.000000e+00 : f32
    %73 = vector.broadcast %cst_23 : f32 to vector<8x128xf32>
    %74 = arith.subf %73, %67 : vector<8x128xf32>
    %75 = arith.mulf %74, %72 : vector<8x128xf32>
    %76 = arith.mulf %67, %44 : vector<8x128xf32>
    %77 = arith.addf %75, %76 : vector<8x128xf32>
    %c0_24 = arith.constant 0 : index
    %c0_25 = arith.constant 0 : index
    %78 = vector.load %arg5[%c0_24, %c0_25] : memref<8x128xf32, #tpu.memory_space<vmem>>, vector<8x128xf32>
    tpu.vector_store %arg5[%c0_24, %c0_25], %77 {strides = array<i32>} : memref<8x128xf32, #tpu.memory_space<vmem>>, vector<8x128xf32>,
    %79 = arith.index_cast %c1_i32 : i32 to index
    %c0_26 = arith.constant 0 : index
    %c0_27 = arith.constant 0 : index
    %80 = vector.load %arg4[%79, %c0_26, %c0_27] : memref<4x8x128xf32, #tpu.memory_space<vmem>>, vector<1x8x128xf32>
    %81 = vector.shape_cast %80 : vector<1x8x128xf32> to vector<8x128xf32>
    %82 = vector.shape_cast %77 : vector<8x128xf32> to vector<1x8x128xf32>
    tpu.vector_store %arg4[%79, %c0_26, %c0_27], %82 {strides = array<i32>} : memref<4x8x128xf32, #tpu.memory_space<vmem>>, vector<1x8x128xf32>,
    %c2_i32 = arith.constant 2 : i32
    %c0_28 = arith.constant 0 : index
    %c0_29 = arith.constant 0 : index
    %83 = vector.load %arg5[%c0_28, %c0_29] : memref<8x128xf32, #tpu.memory_space<vmem>>, vector<8x128xf32>
    %84 = arith.truncf %83 : vector<8x128xf32> to vector<8x128xbf16>
    %cst_30 = arith.constant dense<0.000000e+00> : vector<8x384xf32>
    %85 = tpu.matmul %84, %3, %cst_30 {dimension_numbers = #tpu.dot_dimension_numbers<[1], [0], [0], [1], [0, 0, 1, 1], [], []>} : vector<8x128xbf16>, vector<128x384xbf16>, vector<8x384xf32> -> vector<8x384xf32>
    %86 = vector.broadcast %4 : vector<1x384xf32> to vector<8x384xf32>
    %87 = arith.addf %85, %86 : vector<8x384xf32>
    %88 = arith.index_cast %c2_i32 : i32 to index
    %c0_31 = arith.constant 0 : index
    %c0_32 = arith.constant 0 : index
    %89 = vector.load %arg1[%88, %c0_31, %c0_32] : memref<4x8x384xf32, #tpu.memory_space<vmem>>, vector<1x8x384xf32>
    %90 = vector.shape_cast %89 : vector<1x8x384xf32> to vector<8x384xf32>
    %91 = vector.extract_strided_slice %90 {offsets = [0, 0], sizes = [8, 128], strides = [1, 1]} : vector<8x384xf32> to vector<8x128xf32>
    %92 = vector.extract_strided_slice %87 {offsets = [0, 0], sizes = [8, 128], strides = [1, 1]} : vector<8x384xf32> to vector<8x128xf32>
    %93 = arith.addf %91, %92 : vector<8x128xf32>
    %94 = arith.negf %93 : vector<8x128xf32>
    %95 = math.exp %94 : vector<8x128xf32>
    %cst_33 = arith.constant 1.000000e+00 : f32
    %96 = vector.broadcast %cst_33 : f32 to vector<8x128xf32>
    %97 = arith.addf %96, %95 : vector<8x128xf32>
    %98 = arith.divf %96, %97 : vector<8x128xf32>
    %99 = vector.extract_strided_slice %90 {offsets = [0, 128], sizes = [8, 128], strides = [1, 1]} : vector<8x384xf32> to vector<8x128xf32>
    %100 = vector.extract_strided_slice %87 {offsets = [0, 128], sizes = [8, 128], strides = [1, 1]} : vector<8x384xf32> to vector<8x128xf32>
    %101 = arith.addf %99, %100 : vector<8x128xf32>
    %102 = arith.negf %101 : vector<8x128xf32>
    %103 = math.exp %102 : vector<8x128xf32>
    %cst_34 = arith.constant 1.000000e+00 : f32
    %104 = vector.broadcast %cst_34 : f32 to vector<8x128xf32>
    %105 = arith.addf %104, %103 : vector<8x128xf32>
    %106 = arith.divf %104, %105 : vector<8x128xf32>
    %107 = vector.extract_strided_slice %90 {offsets = [0, 256], sizes = [8, 128], strides = [1, 1]} : vector<8x384xf32> to vector<8x128xf32>
    %108 = vector.extract_strided_slice %87 {offsets = [0, 256], sizes = [8, 128], strides = [1, 1]} : vector<8x384xf32> to vector<8x128xf32>
    %109 = arith.mulf %98, %108 : vector<8x128xf32>
    %110 = arith.addf %107, %109 : vector<8x128xf32>
    %111 = math.tanh %110 : vector<8x128xf32>
    %cst_35 = arith.constant 1.000000e+00 : f32
    %112 = vector.broadcast %cst_35 : f32 to vector<8x128xf32>
    %113 = arith.subf %112, %106 : vector<8x128xf32>
    %114 = arith.mulf %113, %111 : vector<8x128xf32>
    %115 = arith.mulf %106, %83 : vector<8x128xf32>
    %116 = arith.addf %114, %115 : vector<8x128xf32>
    %c0_36 = arith.constant 0 : index
    %c0_37 = arith.constant 0 : index
    %117 = vector.load %arg5[%c0_36, %c0_37] : memref<8x128xf32, #tpu.memory_space<vmem>>, vector<8x128xf32>
    tpu.vector_store %arg5[%c0_36, %c0_37], %116 {strides = array<i32>} : memref<8x128xf32, #tpu.memory_space<vmem>>, vector<8x128xf32>,
    %118 = arith.index_cast %c2_i32 : i32 to index
    %c0_38 = arith.constant 0 : index
    %c0_39 = arith.constant 0 : index
    %119 = vector.load %arg4[%118, %c0_38, %c0_39] : memref<4x8x128xf32, #tpu.memory_space<vmem>>, vector<1x8x128xf32>
    %120 = vector.shape_cast %119 : vector<1x8x128xf32> to vector<8x128xf32>
    %121 = vector.shape_cast %116 : vector<8x128xf32> to vector<1x8x128xf32>
    tpu.vector_store %arg4[%118, %c0_38, %c0_39], %121 {strides = array<i32>} : memref<4x8x128xf32, #tpu.memory_space<vmem>>, vector<1x8x128xf32>,
    %c3_i32 = arith.constant 3 : i32
    %c0_40 = arith.constant 0 : index
    %c0_41 = arith.constant 0 : index
    %122 = vector.load %arg5[%c0_40, %c0_41] : memref<8x128xf32, #tpu.memory_space<vmem>>, vector<8x128xf32>
    %123 = arith.truncf %122 : vector<8x128xf32> to vector<8x128xbf16>
    %cst_42 = arith.constant dense<0.000000e+00> : vector<8x384xf32>
    %124 = tpu.matmul %123, %3, %cst_42 {dimension_numbers = #tpu.dot_dimension_numbers<[1], [0], [0], [1], [0, 0, 1, 1], [], []>} : vector<8x128xbf16>, vector<128x384xbf16>, vector<8x384xf32> -> vector<8x384xf32>
    %125 = vector.broadcast %4 : vector<1x384xf32> to vector<8x384xf32>
    %126 = arith.addf %124, %125 : vector<8x384xf32>
    %127 = arith.index_cast %c3_i32 : i32 to index
    %c0_43 = arith.constant 0 : index
    %c0_44 = arith.constant 0 : index
    %128 = vector.load %arg1[%127, %c0_43, %c0_44] : memref<4x8x384xf32, #tpu.memory_space<vmem>>, vector<1x8x384xf32>
    %129 = vector.shape_cast %128 : vector<1x8x384xf32> to vector<8x384xf32>
    %130 = vector.extract_strided_slice %129 {offsets = [0, 0], sizes = [8, 128], strides = [1, 1]} : vector<8x384xf32> to vector<8x128xf32>
    %131 = vector.extract_strided_slice %126 {offsets = [0, 0], sizes = [8, 128], strides = [1, 1]} : vector<8x384xf32> to vector<8x128xf32>
    %132 = arith.addf %130, %131 : vector<8x128xf32>
    %133 = arith.negf %132 : vector<8x128xf32>
    %134 = math.exp %133 : vector<8x128xf32>
    %cst_45 = arith.constant 1.000000e+00 : f32
    %135 = vector.broadcast %cst_45 : f32 to vector<8x128xf32>
    %136 = arith.addf %135, %134 : vector<8x128xf32>
    %137 = arith.divf %135, %136 : vector<8x128xf32>
    %138 = vector.extract_strided_slice %129 {offsets = [0, 128], sizes = [8, 128], strides = [1, 1]} : vector<8x384xf32> to vector<8x128xf32>
    %139 = vector.extract_strided_slice %126 {offsets = [0, 128], sizes = [8, 128], strides = [1, 1]} : vector<8x384xf32> to vector<8x128xf32>
    %140 = arith.addf %138, %139 : vector<8x128xf32>
    %141 = arith.negf %140 : vector<8x128xf32>
    %142 = math.exp %141 : vector<8x128xf32>
    %cst_46 = arith.constant 1.000000e+00 : f32
    %143 = vector.broadcast %cst_46 : f32 to vector<8x128xf32>
    %144 = arith.addf %143, %142 : vector<8x128xf32>
    %145 = arith.divf %143, %144 : vector<8x128xf32>
    %146 = vector.extract_strided_slice %129 {offsets = [0, 256], sizes = [8, 128], strides = [1, 1]} : vector<8x384xf32> to vector<8x128xf32>
    %147 = vector.extract_strided_slice %126 {offsets = [0, 256], sizes = [8, 128], strides = [1, 1]} : vector<8x384xf32> to vector<8x128xf32>
    %148 = arith.mulf %137, %147 : vector<8x128xf32>
    %149 = arith.addf %146, %148 : vector<8x128xf32>
    %150 = math.tanh %149 : vector<8x128xf32>
    %cst_47 = arith.constant 1.000000e+00 : f32
    %151 = vector.broadcast %cst_47 : f32 to vector<8x128xf32>
    %152 = arith.subf %151, %145 : vector<8x128xf32>
    %153 = arith.mulf %152, %150 : vector<8x128xf32>
    %154 = arith.mulf %145, %122 : vector<8x128xf32>
    %155 = arith.addf %153, %154 : vector<8x128xf32>
    %c0_48 = arith.constant 0 : index
    %c0_49 = arith.constant 0 : index
    %156 = vector.load %arg5[%c0_48, %c0_49] : memref<8x128xf32, #tpu.memory_space<vmem>>, vector<8x128xf32>
    tpu.vector_store %arg5[%c0_48, %c0_49], %155 {strides = array<i32>} : memref<8x128xf32, #tpu.memory_space<vmem>>, vector<8x128xf32>,
    %157 = arith.index_cast %c3_i32 : i32 to index
    %c0_50 = arith.constant 0 : index
    %c0_51 = arith.constant 0 : index
    %158 = vector.load %arg4[%157, %c0_50, %c0_51] : memref<4x8x128xf32, #tpu.memory_space<vmem>>, vector<1x8x128xf32>
    %159 = vector.shape_cast %158 : vector<1x8x128xf32> to vector<8x128xf32>
    %160 = vector.shape_cast %155 : vector<8x128xf32> to vector<1x8x128xf32>
    tpu.vector_store %arg4[%157, %c0_50, %c0_51], %160 {strides = array<i32>} : memref<4x8x128xf32, #tpu.memory_space<vmem>>, vector<1x8x128xf32>,
    %c4_i32 = arith.constant 4 : i32
    return
  }
  func.func @transform_0(%arg0: i32) -> (i32, i32, i32) {
    %c0_i32 = arith.constant 0 : i32
    %c0_i32_0 = arith.constant 0 : i32
    %c0_i32_1 = arith.constant 0 : i32
    return %arg0, %c0_i32, %c0_i32_0 : i32, i32, i32
  }
  func.func @transform_1(%arg0: i32) -> (i32, i32) {
    %c0_i32 = arith.constant 0 : i32
    %c0_i32_0 = arith.constant 0 : i32
    %c0_i32_1 = arith.constant 0 : i32
    return %c0_i32, %c0_i32_0 : i32, i32
  }
  func.func @transform_2(%arg0: i32) -> (i32, i32) {
    %c0_i32 = arith.constant 0 : i32
    %c0_i32_0 = arith.constant 0 : i32
    %c0_i32_1 = arith.constant 0 : i32
    return %c0_i32, %c0_i32_0 : i32, i32
  }
  func.func @transform_3(%arg0: i32) -> (i32, i32, i32) {
    %c0_i32 = arith.constant 0 : i32
    %c0_i32_0 = arith.constant 0 : i32
    %c0_i32_1 = arith.constant 0 : i32
    return %arg0, %c0_i32, %c0_i32_0 : i32, i32, i32
  }
}

module attributes {stable_mosaic.version = 11 : i64} {
  func.func @_gru_seq_kernel(%arg0: i32, %arg1: memref<8x8x384xf32, #tpu.memory_space<vmem>>, %arg2: memref<128x384xbf16, #tpu.memory_space<vmem>>, %arg3: memref<1x384xf32, #tpu.memory_space<vmem>>, %arg4: memref<8x8x128xf32, #tpu.memory_space<vmem>>, %arg5: memref<8x128xf32, #tpu.memory_space<vmem>>) attributes {dimension_semantics = [#tpu.dimension_semantics<arbitrary>], iteration_bounds = array<i64: 1>, scalar_prefetch = 0 : i64, scratch_operands = 1 : i64, tpu.core_type = #tpu.core_type<tc>, window_params = [{transform_indices = @transform_0, window_bounds = array<i64: 8, 8, 384>}, {pipeline_mode = #tpu.pipeline_mode<synchronous>, transform_indices = @transform_1, window_bounds = array<i64: 128, 384>}, {pipeline_mode = #tpu.pipeline_mode<synchronous>, transform_indices = @transform_2, window_bounds = array<i64: 1, 384>}, {transform_indices = @transform_3, window_bounds = array<i64: 8, 8, 128>}]} {
    %c0_i32 = arith.constant 0 : i32
    %0 = arith.cmpi eq, %arg0, %c0_i32 : i32
    %1 = arith.extui %0 : i1 to i32
    %c0_i32_0 = arith.constant 0 : i32
    %2 = arith.cmpi ne, %1, %c0_i32_0 : i32
    scf.if %2 {
      %cst_100 = arith.constant 0.000000e+00 : f32
      %317 = vector.broadcast %cst_100 : f32 to vector<8x128xf32>
      %c0_101 = arith.constant 0 : index
      %c0_102 = arith.constant 0 : index
      %318 = vector.load %arg5[%c0_101, %c0_102] : memref<8x128xf32, #tpu.memory_space<vmem>>, vector<8x128xf32>
      tpu.vector_store %arg5[%c0_101, %c0_102], %317 {strides = array<i32>} : memref<8x128xf32, #tpu.memory_space<vmem>>, vector<8x128xf32>,
    } else {
    }
    %c0 = arith.constant 0 : index
    %c0_1 = arith.constant 0 : index
    %3 = vector.load %arg2[%c0, %c0_1] : memref<128x384xbf16, #tpu.memory_space<vmem>>, vector<128x384xbf16>
    %c0_2 = arith.constant 0 : index
    %c0_3 = arith.constant 0 : index
    %4 = vector.load %arg3[%c0_2, %c0_3] : memref<1x384xf32, #tpu.memory_space<vmem>>, vector<1x384xf32>
    %c0_i32_4 = arith.constant 0 : i32
    %c0_5 = arith.constant 0 : index
    %c0_6 = arith.constant 0 : index
    %5 = vector.load %arg5[%c0_5, %c0_6] : memref<8x128xf32, #tpu.memory_space<vmem>>, vector<8x128xf32>
    %6 = arith.truncf %5 : vector<8x128xf32> to vector<8x128xbf16>
    %cst = arith.constant dense<0.000000e+00> : vector<8x384xf32>
    %7 = tpu.matmul %6, %3, %cst {dimension_numbers = #tpu.dot_dimension_numbers<[1], [0], [0], [1], [0, 0, 1, 1], [], []>} : vector<8x128xbf16>, vector<128x384xbf16>, vector<8x384xf32> -> vector<8x384xf32>
    %8 = vector.broadcast %4 : vector<1x384xf32> to vector<8x384xf32>
    %9 = arith.addf %7, %8 : vector<8x384xf32>
    %10 = arith.index_cast %c0_i32_4 : i32 to index
    %c0_7 = arith.constant 0 : index
    %c0_8 = arith.constant 0 : index
    %11 = vector.load %arg1[%10, %c0_7, %c0_8] : memref<8x8x384xf32, #tpu.memory_space<vmem>>, vector<1x8x384xf32>
    %12 = vector.shape_cast %11 : vector<1x8x384xf32> to vector<8x384xf32>
    %13 = vector.extract_strided_slice %12 {offsets = [0, 0], sizes = [8, 128], strides = [1, 1]} : vector<8x384xf32> to vector<8x128xf32>
    %14 = vector.extract_strided_slice %9 {offsets = [0, 0], sizes = [8, 128], strides = [1, 1]} : vector<8x384xf32> to vector<8x128xf32>
    %15 = arith.addf %13, %14 : vector<8x128xf32>
    %16 = arith.negf %15 : vector<8x128xf32>
    %17 = math.exp %16 : vector<8x128xf32>
    %cst_9 = arith.constant 1.000000e+00 : f32
    %18 = vector.broadcast %cst_9 : f32 to vector<8x128xf32>
    %19 = arith.addf %18, %17 : vector<8x128xf32>
    %20 = arith.divf %18, %19 : vector<8x128xf32>
    %21 = vector.extract_strided_slice %12 {offsets = [0, 128], sizes = [8, 128], strides = [1, 1]} : vector<8x384xf32> to vector<8x128xf32>
    %22 = vector.extract_strided_slice %9 {offsets = [0, 128], sizes = [8, 128], strides = [1, 1]} : vector<8x384xf32> to vector<8x128xf32>
    %23 = arith.addf %21, %22 : vector<8x128xf32>
    %24 = arith.negf %23 : vector<8x128xf32>
    %25 = math.exp %24 : vector<8x128xf32>
    %cst_10 = arith.constant 1.000000e+00 : f32
    %26 = vector.broadcast %cst_10 : f32 to vector<8x128xf32>
    %27 = arith.addf %26, %25 : vector<8x128xf32>
    %28 = arith.divf %26, %27 : vector<8x128xf32>
    %29 = vector.extract_strided_slice %12 {offsets = [0, 256], sizes = [8, 128], strides = [1, 1]} : vector<8x384xf32> to vector<8x128xf32>
    %30 = vector.extract_strided_slice %9 {offsets = [0, 256], sizes = [8, 128], strides = [1, 1]} : vector<8x384xf32> to vector<8x128xf32>
    %31 = arith.mulf %20, %30 : vector<8x128xf32>
    %32 = arith.addf %29, %31 : vector<8x128xf32>
    %33 = math.tanh %32 : vector<8x128xf32>
    %cst_11 = arith.constant 1.000000e+00 : f32
    %34 = vector.broadcast %cst_11 : f32 to vector<8x128xf32>
    %35 = arith.subf %34, %28 : vector<8x128xf32>
    %36 = arith.mulf %35, %33 : vector<8x128xf32>
    %37 = arith.mulf %28, %5 : vector<8x128xf32>
    %38 = arith.addf %36, %37 : vector<8x128xf32>
    %c0_12 = arith.constant 0 : index
    %c0_13 = arith.constant 0 : index
    %39 = vector.load %arg5[%c0_12, %c0_13] : memref<8x128xf32, #tpu.memory_space<vmem>>, vector<8x128xf32>
    tpu.vector_store %arg5[%c0_12, %c0_13], %38 {strides = array<i32>} : memref<8x128xf32, #tpu.memory_space<vmem>>, vector<8x128xf32>,
    %40 = arith.index_cast %c0_i32_4 : i32 to index
    %c0_14 = arith.constant 0 : index
    %c0_15 = arith.constant 0 : index
    %41 = vector.load %arg4[%40, %c0_14, %c0_15] : memref<8x8x128xf32, #tpu.memory_space<vmem>>, vector<1x8x128xf32>
    %42 = vector.shape_cast %41 : vector<1x8x128xf32> to vector<8x128xf32>
    %43 = vector.shape_cast %38 : vector<8x128xf32> to vector<1x8x128xf32>
    tpu.vector_store %arg4[%40, %c0_14, %c0_15], %43 {strides = array<i32>} : memref<8x8x128xf32, #tpu.memory_space<vmem>>, vector<1x8x128xf32>,
    %c1_i32 = arith.constant 1 : i32
    %c0_16 = arith.constant 0 : index
    %c0_17 = arith.constant 0 : index
    %44 = vector.load %arg5[%c0_16, %c0_17] : memref<8x128xf32, #tpu.memory_space<vmem>>, vector<8x128xf32>
    %45 = arith.truncf %44 : vector<8x128xf32> to vector<8x128xbf16>
    %cst_18 = arith.constant dense<0.000000e+00> : vector<8x384xf32>
    %46 = tpu.matmul %45, %3, %cst_18 {dimension_numbers = #tpu.dot_dimension_numbers<[1], [0], [0], [1], [0, 0, 1, 1], [], []>} : vector<8x128xbf16>, vector<128x384xbf16>, vector<8x384xf32> -> vector<8x384xf32>
    %47 = vector.broadcast %4 : vector<1x384xf32> to vector<8x384xf32>
    %48 = arith.addf %46, %47 : vector<8x384xf32>
    %49 = arith.index_cast %c1_i32 : i32 to index
    %c0_19 = arith.constant 0 : index
    %c0_20 = arith.constant 0 : index
    %50 = vector.load %arg1[%49, %c0_19, %c0_20] : memref<8x8x384xf32, #tpu.memory_space<vmem>>, vector<1x8x384xf32>
    %51 = vector.shape_cast %50 : vector<1x8x384xf32> to vector<8x384xf32>
    %52 = vector.extract_strided_slice %51 {offsets = [0, 0], sizes = [8, 128], strides = [1, 1]} : vector<8x384xf32> to vector<8x128xf32>
    %53 = vector.extract_strided_slice %48 {offsets = [0, 0], sizes = [8, 128], strides = [1, 1]} : vector<8x384xf32> to vector<8x128xf32>
    %54 = arith.addf %52, %53 : vector<8x128xf32>
    %55 = arith.negf %54 : vector<8x128xf32>
    %56 = math.exp %55 : vector<8x128xf32>
    %cst_21 = arith.constant 1.000000e+00 : f32
    %57 = vector.broadcast %cst_21 : f32 to vector<8x128xf32>
    %58 = arith.addf %57, %56 : vector<8x128xf32>
    %59 = arith.divf %57, %58 : vector<8x128xf32>
    %60 = vector.extract_strided_slice %51 {offsets = [0, 128], sizes = [8, 128], strides = [1, 1]} : vector<8x384xf32> to vector<8x128xf32>
    %61 = vector.extract_strided_slice %48 {offsets = [0, 128], sizes = [8, 128], strides = [1, 1]} : vector<8x384xf32> to vector<8x128xf32>
    %62 = arith.addf %60, %61 : vector<8x128xf32>
    %63 = arith.negf %62 : vector<8x128xf32>
    %64 = math.exp %63 : vector<8x128xf32>
    %cst_22 = arith.constant 1.000000e+00 : f32
    %65 = vector.broadcast %cst_22 : f32 to vector<8x128xf32>
    %66 = arith.addf %65, %64 : vector<8x128xf32>
    %67 = arith.divf %65, %66 : vector<8x128xf32>
    %68 = vector.extract_strided_slice %51 {offsets = [0, 256], sizes = [8, 128], strides = [1, 1]} : vector<8x384xf32> to vector<8x128xf32>
    %69 = vector.extract_strided_slice %48 {offsets = [0, 256], sizes = [8, 128], strides = [1, 1]} : vector<8x384xf32> to vector<8x128xf32>
    %70 = arith.mulf %59, %69 : vector<8x128xf32>
    %71 = arith.addf %68, %70 : vector<8x128xf32>
    %72 = math.tanh %71 : vector<8x128xf32>
    %cst_23 = arith.constant 1.000000e+00 : f32
    %73 = vector.broadcast %cst_23 : f32 to vector<8x128xf32>
    %74 = arith.subf %73, %67 : vector<8x128xf32>
    %75 = arith.mulf %74, %72 : vector<8x128xf32>
    %76 = arith.mulf %67, %44 : vector<8x128xf32>
    %77 = arith.addf %75, %76 : vector<8x128xf32>
    %c0_24 = arith.constant 0 : index
    %c0_25 = arith.constant 0 : index
    %78 = vector.load %arg5[%c0_24, %c0_25] : memref<8x128xf32, #tpu.memory_space<vmem>>, vector<8x128xf32>
    tpu.vector_store %arg5[%c0_24, %c0_25], %77 {strides = array<i32>} : memref<8x128xf32, #tpu.memory_space<vmem>>, vector<8x128xf32>,
    %79 = arith.index_cast %c1_i32 : i32 to index
    %c0_26 = arith.constant 0 : index
    %c0_27 = arith.constant 0 : index
    %80 = vector.load %arg4[%79, %c0_26, %c0_27] : memref<8x8x128xf32, #tpu.memory_space<vmem>>, vector<1x8x128xf32>
    %81 = vector.shape_cast %80 : vector<1x8x128xf32> to vector<8x128xf32>
    %82 = vector.shape_cast %77 : vector<8x128xf32> to vector<1x8x128xf32>
    tpu.vector_store %arg4[%79, %c0_26, %c0_27], %82 {strides = array<i32>} : memref<8x8x128xf32, #tpu.memory_space<vmem>>, vector<1x8x128xf32>,
    %c2_i32 = arith.constant 2 : i32
    %c0_28 = arith.constant 0 : index
    %c0_29 = arith.constant 0 : index
    %83 = vector.load %arg5[%c0_28, %c0_29] : memref<8x128xf32, #tpu.memory_space<vmem>>, vector<8x128xf32>
    %84 = arith.truncf %83 : vector<8x128xf32> to vector<8x128xbf16>
    %cst_30 = arith.constant dense<0.000000e+00> : vector<8x384xf32>
    %85 = tpu.matmul %84, %3, %cst_30 {dimension_numbers = #tpu.dot_dimension_numbers<[1], [0], [0], [1], [0, 0, 1, 1], [], []>} : vector<8x128xbf16>, vector<128x384xbf16>, vector<8x384xf32> -> vector<8x384xf32>
    %86 = vector.broadcast %4 : vector<1x384xf32> to vector<8x384xf32>
    %87 = arith.addf %85, %86 : vector<8x384xf32>
    %88 = arith.index_cast %c2_i32 : i32 to index
    %c0_31 = arith.constant 0 : index
    %c0_32 = arith.constant 0 : index
    %89 = vector.load %arg1[%88, %c0_31, %c0_32] : memref<8x8x384xf32, #tpu.memory_space<vmem>>, vector<1x8x384xf32>
    %90 = vector.shape_cast %89 : vector<1x8x384xf32> to vector<8x384xf32>
    %91 = vector.extract_strided_slice %90 {offsets = [0, 0], sizes = [8, 128], strides = [1, 1]} : vector<8x384xf32> to vector<8x128xf32>
    %92 = vector.extract_strided_slice %87 {offsets = [0, 0], sizes = [8, 128], strides = [1, 1]} : vector<8x384xf32> to vector<8x128xf32>
    %93 = arith.addf %91, %92 : vector<8x128xf32>
    %94 = arith.negf %93 : vector<8x128xf32>
    %95 = math.exp %94 : vector<8x128xf32>
    %cst_33 = arith.constant 1.000000e+00 : f32
    %96 = vector.broadcast %cst_33 : f32 to vector<8x128xf32>
    %97 = arith.addf %96, %95 : vector<8x128xf32>
    %98 = arith.divf %96, %97 : vector<8x128xf32>
    %99 = vector.extract_strided_slice %90 {offsets = [0, 128], sizes = [8, 128], strides = [1, 1]} : vector<8x384xf32> to vector<8x128xf32>
    %100 = vector.extract_strided_slice %87 {offsets = [0, 128], sizes = [8, 128], strides = [1, 1]} : vector<8x384xf32> to vector<8x128xf32>
    %101 = arith.addf %99, %100 : vector<8x128xf32>
    %102 = arith.negf %101 : vector<8x128xf32>
    %103 = math.exp %102 : vector<8x128xf32>
    %cst_34 = arith.constant 1.000000e+00 : f32
    %104 = vector.broadcast %cst_34 : f32 to vector<8x128xf32>
    %105 = arith.addf %104, %103 : vector<8x128xf32>
    %106 = arith.divf %104, %105 : vector<8x128xf32>
    %107 = vector.extract_strided_slice %90 {offsets = [0, 256], sizes = [8, 128], strides = [1, 1]} : vector<8x384xf32> to vector<8x128xf32>
    %108 = vector.extract_strided_slice %87 {offsets = [0, 256], sizes = [8, 128], strides = [1, 1]} : vector<8x384xf32> to vector<8x128xf32>
    %109 = arith.mulf %98, %108 : vector<8x128xf32>
    %110 = arith.addf %107, %109 : vector<8x128xf32>
    %111 = math.tanh %110 : vector<8x128xf32>
    %cst_35 = arith.constant 1.000000e+00 : f32
    %112 = vector.broadcast %cst_35 : f32 to vector<8x128xf32>
    %113 = arith.subf %112, %106 : vector<8x128xf32>
    %114 = arith.mulf %113, %111 : vector<8x128xf32>
    %115 = arith.mulf %106, %83 : vector<8x128xf32>
    %116 = arith.addf %114, %115 : vector<8x128xf32>
    %c0_36 = arith.constant 0 : index
    %c0_37 = arith.constant 0 : index
    %117 = vector.load %arg5[%c0_36, %c0_37] : memref<8x128xf32, #tpu.memory_space<vmem>>, vector<8x128xf32>
    tpu.vector_store %arg5[%c0_36, %c0_37], %116 {strides = array<i32>} : memref<8x128xf32, #tpu.memory_space<vmem>>, vector<8x128xf32>,
    %118 = arith.index_cast %c2_i32 : i32 to index
    %c0_38 = arith.constant 0 : index
    %c0_39 = arith.constant 0 : index
    %119 = vector.load %arg4[%118, %c0_38, %c0_39] : memref<8x8x128xf32, #tpu.memory_space<vmem>>, vector<1x8x128xf32>
    %120 = vector.shape_cast %119 : vector<1x8x128xf32> to vector<8x128xf32>
    %121 = vector.shape_cast %116 : vector<8x128xf32> to vector<1x8x128xf32>
    tpu.vector_store %arg4[%118, %c0_38, %c0_39], %121 {strides = array<i32>} : memref<8x8x128xf32, #tpu.memory_space<vmem>>, vector<1x8x128xf32>,
    %c3_i32 = arith.constant 3 : i32
    %c0_40 = arith.constant 0 : index
    %c0_41 = arith.constant 0 : index
    %122 = vector.load %arg5[%c0_40, %c0_41] : memref<8x128xf32, #tpu.memory_space<vmem>>, vector<8x128xf32>
    %123 = arith.truncf %122 : vector<8x128xf32> to vector<8x128xbf16>
    %cst_42 = arith.constant dense<0.000000e+00> : vector<8x384xf32>
    %124 = tpu.matmul %123, %3, %cst_42 {dimension_numbers = #tpu.dot_dimension_numbers<[1], [0], [0], [1], [0, 0, 1, 1], [], []>} : vector<8x128xbf16>, vector<128x384xbf16>, vector<8x384xf32> -> vector<8x384xf32>
    %125 = vector.broadcast %4 : vector<1x384xf32> to vector<8x384xf32>
    %126 = arith.addf %124, %125 : vector<8x384xf32>
    %127 = arith.index_cast %c3_i32 : i32 to index
    %c0_43 = arith.constant 0 : index
    %c0_44 = arith.constant 0 : index
    %128 = vector.load %arg1[%127, %c0_43, %c0_44] : memref<8x8x384xf32, #tpu.memory_space<vmem>>, vector<1x8x384xf32>
    %129 = vector.shape_cast %128 : vector<1x8x384xf32> to vector<8x384xf32>
    %130 = vector.extract_strided_slice %129 {offsets = [0, 0], sizes = [8, 128], strides = [1, 1]} : vector<8x384xf32> to vector<8x128xf32>
    %131 = vector.extract_strided_slice %126 {offsets = [0, 0], sizes = [8, 128], strides = [1, 1]} : vector<8x384xf32> to vector<8x128xf32>
    %132 = arith.addf %130, %131 : vector<8x128xf32>
    %133 = arith.negf %132 : vector<8x128xf32>
    %134 = math.exp %133 : vector<8x128xf32>
    %cst_45 = arith.constant 1.000000e+00 : f32
    %135 = vector.broadcast %cst_45 : f32 to vector<8x128xf32>
    %136 = arith.addf %135, %134 : vector<8x128xf32>
    %137 = arith.divf %135, %136 : vector<8x128xf32>
    %138 = vector.extract_strided_slice %129 {offsets = [0, 128], sizes = [8, 128], strides = [1, 1]} : vector<8x384xf32> to vector<8x128xf32>
    %139 = vector.extract_strided_slice %126 {offsets = [0, 128], sizes = [8, 128], strides = [1, 1]} : vector<8x384xf32> to vector<8x128xf32>
    %140 = arith.addf %138, %139 : vector<8x128xf32>
    %141 = arith.negf %140 : vector<8x128xf32>
    %142 = math.exp %141 : vector<8x128xf32>
    %cst_46 = arith.constant 1.000000e+00 : f32
    %143 = vector.broadcast %cst_46 : f32 to vector<8x128xf32>
    %144 = arith.addf %143, %142 : vector<8x128xf32>
    %145 = arith.divf %143, %144 : vector<8x128xf32>
    %146 = vector.extract_strided_slice %129 {offsets = [0, 256], sizes = [8, 128], strides = [1, 1]} : vector<8x384xf32> to vector<8x128xf32>
    %147 = vector.extract_strided_slice %126 {offsets = [0, 256], sizes = [8, 128], strides = [1, 1]} : vector<8x384xf32> to vector<8x128xf32>
    %148 = arith.mulf %137, %147 : vector<8x128xf32>
    %149 = arith.addf %146, %148 : vector<8x128xf32>
    %150 = math.tanh %149 : vector<8x128xf32>
    %cst_47 = arith.constant 1.000000e+00 : f32
    %151 = vector.broadcast %cst_47 : f32 to vector<8x128xf32>
    %152 = arith.subf %151, %145 : vector<8x128xf32>
    %153 = arith.mulf %152, %150 : vector<8x128xf32>
    %154 = arith.mulf %145, %122 : vector<8x128xf32>
    %155 = arith.addf %153, %154 : vector<8x128xf32>
    %c0_48 = arith.constant 0 : index
    %c0_49 = arith.constant 0 : index
    %156 = vector.load %arg5[%c0_48, %c0_49] : memref<8x128xf32, #tpu.memory_space<vmem>>, vector<8x128xf32>
    tpu.vector_store %arg5[%c0_48, %c0_49], %155 {strides = array<i32>} : memref<8x128xf32, #tpu.memory_space<vmem>>, vector<8x128xf32>,
    %157 = arith.index_cast %c3_i32 : i32 to index
    %c0_50 = arith.constant 0 : index
    %c0_51 = arith.constant 0 : index
    %158 = vector.load %arg4[%157, %c0_50, %c0_51] : memref<8x8x128xf32, #tpu.memory_space<vmem>>, vector<1x8x128xf32>
    %159 = vector.shape_cast %158 : vector<1x8x128xf32> to vector<8x128xf32>
    %160 = vector.shape_cast %155 : vector<8x128xf32> to vector<1x8x128xf32>
    tpu.vector_store %arg4[%157, %c0_50, %c0_51], %160 {strides = array<i32>} : memref<8x8x128xf32, #tpu.memory_space<vmem>>, vector<1x8x128xf32>,
    %c4_i32 = arith.constant 4 : i32
    %c0_52 = arith.constant 0 : index
    %c0_53 = arith.constant 0 : index
    %161 = vector.load %arg5[%c0_52, %c0_53] : memref<8x128xf32, #tpu.memory_space<vmem>>, vector<8x128xf32>
    %162 = arith.truncf %161 : vector<8x128xf32> to vector<8x128xbf16>
    %cst_54 = arith.constant dense<0.000000e+00> : vector<8x384xf32>
    %163 = tpu.matmul %162, %3, %cst_54 {dimension_numbers = #tpu.dot_dimension_numbers<[1], [0], [0], [1], [0, 0, 1, 1], [], []>} : vector<8x128xbf16>, vector<128x384xbf16>, vector<8x384xf32> -> vector<8x384xf32>
    %164 = vector.broadcast %4 : vector<1x384xf32> to vector<8x384xf32>
    %165 = arith.addf %163, %164 : vector<8x384xf32>
    %166 = arith.index_cast %c4_i32 : i32 to index
    %c0_55 = arith.constant 0 : index
    %c0_56 = arith.constant 0 : index
    %167 = vector.load %arg1[%166, %c0_55, %c0_56] : memref<8x8x384xf32, #tpu.memory_space<vmem>>, vector<1x8x384xf32>
    %168 = vector.shape_cast %167 : vector<1x8x384xf32> to vector<8x384xf32>
    %169 = vector.extract_strided_slice %168 {offsets = [0, 0], sizes = [8, 128], strides = [1, 1]} : vector<8x384xf32> to vector<8x128xf32>
    %170 = vector.extract_strided_slice %165 {offsets = [0, 0], sizes = [8, 128], strides = [1, 1]} : vector<8x384xf32> to vector<8x128xf32>
    %171 = arith.addf %169, %170 : vector<8x128xf32>
    %172 = arith.negf %171 : vector<8x128xf32>
    %173 = math.exp %172 : vector<8x128xf32>
    %cst_57 = arith.constant 1.000000e+00 : f32
    %174 = vector.broadcast %cst_57 : f32 to vector<8x128xf32>
    %175 = arith.addf %174, %173 : vector<8x128xf32>
    %176 = arith.divf %174, %175 : vector<8x128xf32>
    %177 = vector.extract_strided_slice %168 {offsets = [0, 128], sizes = [8, 128], strides = [1, 1]} : vector<8x384xf32> to vector<8x128xf32>
    %178 = vector.extract_strided_slice %165 {offsets = [0, 128], sizes = [8, 128], strides = [1, 1]} : vector<8x384xf32> to vector<8x128xf32>
    %179 = arith.addf %177, %178 : vector<8x128xf32>
    %180 = arith.negf %179 : vector<8x128xf32>
    %181 = math.exp %180 : vector<8x128xf32>
    %cst_58 = arith.constant 1.000000e+00 : f32
    %182 = vector.broadcast %cst_58 : f32 to vector<8x128xf32>
    %183 = arith.addf %182, %181 : vector<8x128xf32>
    %184 = arith.divf %182, %183 : vector<8x128xf32>
    %185 = vector.extract_strided_slice %168 {offsets = [0, 256], sizes = [8, 128], strides = [1, 1]} : vector<8x384xf32> to vector<8x128xf32>
    %186 = vector.extract_strided_slice %165 {offsets = [0, 256], sizes = [8, 128], strides = [1, 1]} : vector<8x384xf32> to vector<8x128xf32>
    %187 = arith.mulf %176, %186 : vector<8x128xf32>
    %188 = arith.addf %185, %187 : vector<8x128xf32>
    %189 = math.tanh %188 : vector<8x128xf32>
    %cst_59 = arith.constant 1.000000e+00 : f32
    %190 = vector.broadcast %cst_59 : f32 to vector<8x128xf32>
    %191 = arith.subf %190, %184 : vector<8x128xf32>
    %192 = arith.mulf %191, %189 : vector<8x128xf32>
    %193 = arith.mulf %184, %161 : vector<8x128xf32>
    %194 = arith.addf %192, %193 : vector<8x128xf32>
    %c0_60 = arith.constant 0 : index
    %c0_61 = arith.constant 0 : index
    %195 = vector.load %arg5[%c0_60, %c0_61] : memref<8x128xf32, #tpu.memory_space<vmem>>, vector<8x128xf32>
    tpu.vector_store %arg5[%c0_60, %c0_61], %194 {strides = array<i32>} : memref<8x128xf32, #tpu.memory_space<vmem>>, vector<8x128xf32>,
    %196 = arith.index_cast %c4_i32 : i32 to index
    %c0_62 = arith.constant 0 : index
    %c0_63 = arith.constant 0 : index
    %197 = vector.load %arg4[%196, %c0_62, %c0_63] : memref<8x8x128xf32, #tpu.memory_space<vmem>>, vector<1x8x128xf32>
    %198 = vector.shape_cast %197 : vector<1x8x128xf32> to vector<8x128xf32>
    %199 = vector.shape_cast %194 : vector<8x128xf32> to vector<1x8x128xf32>
    tpu.vector_store %arg4[%196, %c0_62, %c0_63], %199 {strides = array<i32>} : memref<8x8x128xf32, #tpu.memory_space<vmem>>, vector<1x8x128xf32>,
    %c5_i32 = arith.constant 5 : i32
    %c0_64 = arith.constant 0 : index
    %c0_65 = arith.constant 0 : index
    %200 = vector.load %arg5[%c0_64, %c0_65] : memref<8x128xf32, #tpu.memory_space<vmem>>, vector<8x128xf32>
    %201 = arith.truncf %200 : vector<8x128xf32> to vector<8x128xbf16>
    %cst_66 = arith.constant dense<0.000000e+00> : vector<8x384xf32>
    %202 = tpu.matmul %201, %3, %cst_66 {dimension_numbers = #tpu.dot_dimension_numbers<[1], [0], [0], [1], [0, 0, 1, 1], [], []>} : vector<8x128xbf16>, vector<128x384xbf16>, vector<8x384xf32> -> vector<8x384xf32>
    %203 = vector.broadcast %4 : vector<1x384xf32> to vector<8x384xf32>
    %204 = arith.addf %202, %203 : vector<8x384xf32>
    %205 = arith.index_cast %c5_i32 : i32 to index
    %c0_67 = arith.constant 0 : index
    %c0_68 = arith.constant 0 : index
    %206 = vector.load %arg1[%205, %c0_67, %c0_68] : memref<8x8x384xf32, #tpu.memory_space<vmem>>, vector<1x8x384xf32>
    %207 = vector.shape_cast %206 : vector<1x8x384xf32> to vector<8x384xf32>
    %208 = vector.extract_strided_slice %207 {offsets = [0, 0], sizes = [8, 128], strides = [1, 1]} : vector<8x384xf32> to vector<8x128xf32>
    %209 = vector.extract_strided_slice %204 {offsets = [0, 0], sizes = [8, 128], strides = [1, 1]} : vector<8x384xf32> to vector<8x128xf32>
    %210 = arith.addf %208, %209 : vector<8x128xf32>
    %211 = arith.negf %210 : vector<8x128xf32>
    %212 = math.exp %211 : vector<8x128xf32>
    %cst_69 = arith.constant 1.000000e+00 : f32
    %213 = vector.broadcast %cst_69 : f32 to vector<8x128xf32>
    %214 = arith.addf %213, %212 : vector<8x128xf32>
    %215 = arith.divf %213, %214 : vector<8x128xf32>
    %216 = vector.extract_strided_slice %207 {offsets = [0, 128], sizes = [8, 128], strides = [1, 1]} : vector<8x384xf32> to vector<8x128xf32>
    %217 = vector.extract_strided_slice %204 {offsets = [0, 128], sizes = [8, 128], strides = [1, 1]} : vector<8x384xf32> to vector<8x128xf32>
    %218 = arith.addf %216, %217 : vector<8x128xf32>
    %219 = arith.negf %218 : vector<8x128xf32>
    %220 = math.exp %219 : vector<8x128xf32>
    %cst_70 = arith.constant 1.000000e+00 : f32
    %221 = vector.broadcast %cst_70 : f32 to vector<8x128xf32>
    %222 = arith.addf %221, %220 : vector<8x128xf32>
    %223 = arith.divf %221, %222 : vector<8x128xf32>
    %224 = vector.extract_strided_slice %207 {offsets = [0, 256], sizes = [8, 128], strides = [1, 1]} : vector<8x384xf32> to vector<8x128xf32>
    %225 = vector.extract_strided_slice %204 {offsets = [0, 256], sizes = [8, 128], strides = [1, 1]} : vector<8x384xf32> to vector<8x128xf32>
    %226 = arith.mulf %215, %225 : vector<8x128xf32>
    %227 = arith.addf %224, %226 : vector<8x128xf32>
    %228 = math.tanh %227 : vector<8x128xf32>
    %cst_71 = arith.constant 1.000000e+00 : f32
    %229 = vector.broadcast %cst_71 : f32 to vector<8x128xf32>
    %230 = arith.subf %229, %223 : vector<8x128xf32>
    %231 = arith.mulf %230, %228 : vector<8x128xf32>
    %232 = arith.mulf %223, %200 : vector<8x128xf32>
    %233 = arith.addf %231, %232 : vector<8x128xf32>
    %c0_72 = arith.constant 0 : index
    %c0_73 = arith.constant 0 : index
    %234 = vector.load %arg5[%c0_72, %c0_73] : memref<8x128xf32, #tpu.memory_space<vmem>>, vector<8x128xf32>
    tpu.vector_store %arg5[%c0_72, %c0_73], %233 {strides = array<i32>} : memref<8x128xf32, #tpu.memory_space<vmem>>, vector<8x128xf32>,
    %235 = arith.index_cast %c5_i32 : i32 to index
    %c0_74 = arith.constant 0 : index
    %c0_75 = arith.constant 0 : index
    %236 = vector.load %arg4[%235, %c0_74, %c0_75] : memref<8x8x128xf32, #tpu.memory_space<vmem>>, vector<1x8x128xf32>
    %237 = vector.shape_cast %236 : vector<1x8x128xf32> to vector<8x128xf32>
    %238 = vector.shape_cast %233 : vector<8x128xf32> to vector<1x8x128xf32>
    tpu.vector_store %arg4[%235, %c0_74, %c0_75], %238 {strides = array<i32>} : memref<8x8x128xf32, #tpu.memory_space<vmem>>, vector<1x8x128xf32>,
    %c6_i32 = arith.constant 6 : i32
    %c0_76 = arith.constant 0 : index
    %c0_77 = arith.constant 0 : index
    %239 = vector.load %arg5[%c0_76, %c0_77] : memref<8x128xf32, #tpu.memory_space<vmem>>, vector<8x128xf32>
    %240 = arith.truncf %239 : vector<8x128xf32> to vector<8x128xbf16>
    %cst_78 = arith.constant dense<0.000000e+00> : vector<8x384xf32>
    %241 = tpu.matmul %240, %3, %cst_78 {dimension_numbers = #tpu.dot_dimension_numbers<[1], [0], [0], [1], [0, 0, 1, 1], [], []>} : vector<8x128xbf16>, vector<128x384xbf16>, vector<8x384xf32> -> vector<8x384xf32>
    %242 = vector.broadcast %4 : vector<1x384xf32> to vector<8x384xf32>
    %243 = arith.addf %241, %242 : vector<8x384xf32>
    %244 = arith.index_cast %c6_i32 : i32 to index
    %c0_79 = arith.constant 0 : index
    %c0_80 = arith.constant 0 : index
    %245 = vector.load %arg1[%244, %c0_79, %c0_80] : memref<8x8x384xf32, #tpu.memory_space<vmem>>, vector<1x8x384xf32>
    %246 = vector.shape_cast %245 : vector<1x8x384xf32> to vector<8x384xf32>
    %247 = vector.extract_strided_slice %246 {offsets = [0, 0], sizes = [8, 128], strides = [1, 1]} : vector<8x384xf32> to vector<8x128xf32>
    %248 = vector.extract_strided_slice %243 {offsets = [0, 0], sizes = [8, 128], strides = [1, 1]} : vector<8x384xf32> to vector<8x128xf32>
    %249 = arith.addf %247, %248 : vector<8x128xf32>
    %250 = arith.negf %249 : vector<8x128xf32>
    %251 = math.exp %250 : vector<8x128xf32>
    %cst_81 = arith.constant 1.000000e+00 : f32
    %252 = vector.broadcast %cst_81 : f32 to vector<8x128xf32>
    %253 = arith.addf %252, %251 : vector<8x128xf32>
    %254 = arith.divf %252, %253 : vector<8x128xf32>
    %255 = vector.extract_strided_slice %246 {offsets = [0, 128], sizes = [8, 128], strides = [1, 1]} : vector<8x384xf32> to vector<8x128xf32>
    %256 = vector.extract_strided_slice %243 {offsets = [0, 128], sizes = [8, 128], strides = [1, 1]} : vector<8x384xf32> to vector<8x128xf32>
    %257 = arith.addf %255, %256 : vector<8x128xf32>
    %258 = arith.negf %257 : vector<8x128xf32>
    %259 = math.exp %258 : vector<8x128xf32>
    %cst_82 = arith.constant 1.000000e+00 : f32
    %260 = vector.broadcast %cst_82 : f32 to vector<8x128xf32>
    %261 = arith.addf %260, %259 : vector<8x128xf32>
    %262 = arith.divf %260, %261 : vector<8x128xf32>
    %263 = vector.extract_strided_slice %246 {offsets = [0, 256], sizes = [8, 128], strides = [1, 1]} : vector<8x384xf32> to vector<8x128xf32>
    %264 = vector.extract_strided_slice %243 {offsets = [0, 256], sizes = [8, 128], strides = [1, 1]} : vector<8x384xf32> to vector<8x128xf32>
    %265 = arith.mulf %254, %264 : vector<8x128xf32>
    %266 = arith.addf %263, %265 : vector<8x128xf32>
    %267 = math.tanh %266 : vector<8x128xf32>
    %cst_83 = arith.constant 1.000000e+00 : f32
    %268 = vector.broadcast %cst_83 : f32 to vector<8x128xf32>
    %269 = arith.subf %268, %262 : vector<8x128xf32>
    %270 = arith.mulf %269, %267 : vector<8x128xf32>
    %271 = arith.mulf %262, %239 : vector<8x128xf32>
    %272 = arith.addf %270, %271 : vector<8x128xf32>
    %c0_84 = arith.constant 0 : index
    %c0_85 = arith.constant 0 : index
    %273 = vector.load %arg5[%c0_84, %c0_85] : memref<8x128xf32, #tpu.memory_space<vmem>>, vector<8x128xf32>
    tpu.vector_store %arg5[%c0_84, %c0_85], %272 {strides = array<i32>} : memref<8x128xf32, #tpu.memory_space<vmem>>, vector<8x128xf32>,
    %274 = arith.index_cast %c6_i32 : i32 to index
    %c0_86 = arith.constant 0 : index
    %c0_87 = arith.constant 0 : index
    %275 = vector.load %arg4[%274, %c0_86, %c0_87] : memref<8x8x128xf32, #tpu.memory_space<vmem>>, vector<1x8x128xf32>
    %276 = vector.shape_cast %275 : vector<1x8x128xf32> to vector<8x128xf32>
    %277 = vector.shape_cast %272 : vector<8x128xf32> to vector<1x8x128xf32>
    tpu.vector_store %arg4[%274, %c0_86, %c0_87], %277 {strides = array<i32>} : memref<8x8x128xf32, #tpu.memory_space<vmem>>, vector<1x8x128xf32>,
    %c7_i32 = arith.constant 7 : i32
    %c0_88 = arith.constant 0 : index
    %c0_89 = arith.constant 0 : index
    %278 = vector.load %arg5[%c0_88, %c0_89] : memref<8x128xf32, #tpu.memory_space<vmem>>, vector<8x128xf32>
    %279 = arith.truncf %278 : vector<8x128xf32> to vector<8x128xbf16>
    %cst_90 = arith.constant dense<0.000000e+00> : vector<8x384xf32>
    %280 = tpu.matmul %279, %3, %cst_90 {dimension_numbers = #tpu.dot_dimension_numbers<[1], [0], [0], [1], [0, 0, 1, 1], [], []>} : vector<8x128xbf16>, vector<128x384xbf16>, vector<8x384xf32> -> vector<8x384xf32>
    %281 = vector.broadcast %4 : vector<1x384xf32> to vector<8x384xf32>
    %282 = arith.addf %280, %281 : vector<8x384xf32>
    %283 = arith.index_cast %c7_i32 : i32 to index
    %c0_91 = arith.constant 0 : index
    %c0_92 = arith.constant 0 : index
    %284 = vector.load %arg1[%283, %c0_91, %c0_92] : memref<8x8x384xf32, #tpu.memory_space<vmem>>, vector<1x8x384xf32>
    %285 = vector.shape_cast %284 : vector<1x8x384xf32> to vector<8x384xf32>
    %286 = vector.extract_strided_slice %285 {offsets = [0, 0], sizes = [8, 128], strides = [1, 1]} : vector<8x384xf32> to vector<8x128xf32>
    %287 = vector.extract_strided_slice %282 {offsets = [0, 0], sizes = [8, 128], strides = [1, 1]} : vector<8x384xf32> to vector<8x128xf32>
    %288 = arith.addf %286, %287 : vector<8x128xf32>
    %289 = arith.negf %288 : vector<8x128xf32>
    %290 = math.exp %289 : vector<8x128xf32>
    %cst_93 = arith.constant 1.000000e+00 : f32
    %291 = vector.broadcast %cst_93 : f32 to vector<8x128xf32>
    %292 = arith.addf %291, %290 : vector<8x128xf32>
    %293 = arith.divf %291, %292 : vector<8x128xf32>
    %294 = vector.extract_strided_slice %285 {offsets = [0, 128], sizes = [8, 128], strides = [1, 1]} : vector<8x384xf32> to vector<8x128xf32>
    %295 = vector.extract_strided_slice %282 {offsets = [0, 128], sizes = [8, 128], strides = [1, 1]} : vector<8x384xf32> to vector<8x128xf32>
    %296 = arith.addf %294, %295 : vector<8x128xf32>
    %297 = arith.negf %296 : vector<8x128xf32>
    %298 = math.exp %297 : vector<8x128xf32>
    %cst_94 = arith.constant 1.000000e+00 : f32
    %299 = vector.broadcast %cst_94 : f32 to vector<8x128xf32>
    %300 = arith.addf %299, %298 : vector<8x128xf32>
    %301 = arith.divf %299, %300 : vector<8x128xf32>
    %302 = vector.extract_strided_slice %285 {offsets = [0, 256], sizes = [8, 128], strides = [1, 1]} : vector<8x384xf32> to vector<8x128xf32>
    %303 = vector.extract_strided_slice %282 {offsets = [0, 256], sizes = [8, 128], strides = [1, 1]} : vector<8x384xf32> to vector<8x128xf32>
    %304 = arith.mulf %293, %303 : vector<8x128xf32>
    %305 = arith.addf %302, %304 : vector<8x128xf32>
    %306 = math.tanh %305 : vector<8x128xf32>
    %cst_95 = arith.constant 1.000000e+00 : f32
    %307 = vector.broadcast %cst_95 : f32 to vector<8x128xf32>
    %308 = arith.subf %307, %301 : vector<8x128xf32>
    %309 = arith.mulf %308, %306 : vector<8x128xf32>
    %310 = arith.mulf %301, %278 : vector<8x128xf32>
    %311 = arith.addf %309, %310 : vector<8x128xf32>
    %c0_96 = arith.constant 0 : index
    %c0_97 = arith.constant 0 : index
    %312 = vector.load %arg5[%c0_96, %c0_97] : memref<8x128xf32, #tpu.memory_space<vmem>>, vector<8x128xf32>
    tpu.vector_store %arg5[%c0_96, %c0_97], %311 {strides = array<i32>} : memref<8x128xf32, #tpu.memory_space<vmem>>, vector<8x128xf32>,
    %313 = arith.index_cast %c7_i32 : i32 to index
    %c0_98 = arith.constant 0 : index
    %c0_99 = arith.constant 0 : index
    %314 = vector.load %arg4[%313, %c0_98, %c0_99] : memref<8x8x128xf32, #tpu.memory_space<vmem>>, vector<1x8x128xf32>
    %315 = vector.shape_cast %314 : vector<1x8x128xf32> to vector<8x128xf32>
    %316 = vector.shape_cast %311 : vector<8x128xf32> to vector<1x8x128xf32>
    tpu.vector_store %arg4[%313, %c0_98, %c0_99], %316 {strides = array<i32>} : memref<8x8x128xf32, #tpu.memory_space<vmem>>, vector<1x8x128xf32>,
    %c8_i32 = arith.constant 8 : i32
    return
  }
  func.func @transform_0(%arg0: i32) -> (i32, i32, i32) {
    %c0_i32 = arith.constant 0 : i32
    %c0_i32_0 = arith.constant 0 : i32
    %c0_i32_1 = arith.constant 0 : i32
    return %arg0, %c0_i32, %c0_i32_0 : i32, i32, i32
  }
  func.func @transform_1(%arg0: i32) -> (i32, i32) {
    %c0_i32 = arith.constant 0 : i32
    %c0_i32_0 = arith.constant 0 : i32
    %c0_i32_1 = arith.constant 0 : i32
    return %c0_i32, %c0_i32_0 : i32, i32
  }
  func.func @transform_2(%arg0: i32) -> (i32, i32) {
    %c0_i32 = arith.constant 0 : i32
    %c0_i32_0 = arith.constant 0 : i32
    %c0_i32_1 = arith.constant 0 : i32
    return %c0_i32, %c0_i32_0 : i32, i32
  }
  func.func @transform_3(%arg0: i32) -> (i32, i32, i32) {
    %c0_i32 = arith.constant 0 : i32
    %c0_i32_0 = arith.constant 0 : i32
    %c0_i32_1 = arith.constant 0 : i32
    return %arg0, %c0_i32, %c0_i32_0 : i32, i32, i32
  }
}

</mosaic_0001>

<bundles_post_ra>
// kernel: encoder_drnn_forward.3
= control target key start
LH: loop header
LB: loop body
LE: loop exit
PB: predicated region body
PF: predicated region fallthrough
CT: control target
= control target key end

     0   :  { %v879_v1 = vmov 0.0   ;;  %v880_v2 = vmov 0   ;;  %vm881_vm0 = vmmov 0   ;;  %v882_v25 = vmov 0.0|0.0   ;;  %s1244_s1 = inlined_call_operand.vmem [shape: bf16[128,384], index: 1, kind: input, shape index: {}]   ;;  %s1245_s2 = inlined_call_operand.vmem [shape: f32[1,384], index: 2, kind: input, shape index: {}]   ;;  %s1246_s0 = inlined_call_operand.vmem [shape: f32[4,8,384], index: 0, kind: input, shape index: {}]   ;;  %s1247_s3 = inlined_call_operand.vmem [shape: f32[4,8,128], index: 3, kind: output, shape index: {}]  }
   0x1   :  { %v906_v0 = vld [vmem:[%s1244_s1 + $0xac] ss:$12 sps:$4 sm:$0xff]   ;;  %723 = vmatprep.subr.bf16.mxu1 %v879_v1  ;;  %231 = vmatprep.mubr.bf16.mxu0 %v880_v2  ;;  %v913_v3 = vld [vmem:[%s1244_s1 + $0xa8] ss:$12 sps:$4 sm:$0xff]   ;;  %v927_v5 = vld [vmem:[%s1244_s1 + $0x90] ss:$12 sps:$4 sm:$0xff]   ;;  %v56_v27 = vlaneseq }
   0x2   :  { %739 = vmatprep.mubr.msk.bf16.mxu1 %vm881_vm0, %v879_v1  ;;  %199 = vmatprep.subr.bf16.mxu0 %v906_v0  ;;  %v921_v4 = vld [vmem:[%s1244_s1 + $0x94] ss:$12 sps:$4 sm:$0xff]   ;;  %v933_v6 = vld [vmem:[%s1244_s1 + $0x7c] ss:$12 sps:$4 sm:$0xff]   ;;  %v939_v7 = vld [vmem:[%s1244_s1 + $0x78] ss:$12 sps:$4 sm:$0xff]  }
   0x3   :  { %200 = vmatpush1.bf16.msra.mxu0 %v913_v3  ;;  %v945_v8 = vld [vmem:[%s1244_s1 + $0x64] ss:$12 sps:$4 sm:$0xff]   ;;  %v950_v9 = vld [vmem:[%s1244_s1 + $0x60] ss:$12 sps:$4 sm:$0xff]   ;;  %v975_v13 = vld [vmem:[%s1244_s1 + $0x48] ss:$12 sps:$4 sm:$0xff]  }
   0x4   :  { %201 = vmatprep.subr.bf16.mxu0 %v921_v4  ;;  %v956_v10 = vld [vmem:[%s1244_s1 + $0xb0] ss:$12 sps:$4 sm:$0xff]   ;;  %v962_v11 = vld [vmem:[%s1244_s1 + $0x4c] ss:$12 sps:$4 sm:$0xff]   ;;  %v981_v14 = vld [vmem:[%s1244_s1 + $0x34] ss:$12 sps:$4 sm:$0xff]  }
   0x5   :  { %724 = vmatpush3.bf16.msra.mxu1 %v956_v10  ;;  %v968_v12 = vld [vmem:[%s1244_s1 + $0x98] ss:$12 sps:$4 sm:$0xff]   ;;  %v987_v15 = vld [vmem:[%s1244_s1 + $0x80] ss:$12 sps:$4 sm:$0xff]   ;;  %v994_v16 = vld [vmem:[%s1244_s1 + $0x30] ss:$12 sps:$4 sm:$0xff]  }
   0x6   :  { %725 = vmatprep.subr.bf16.mxu1 %v879_v1  ;;  %v1000_v17 = vld [vmem:[%s1244_s1 + $0x1c] ss:$12 sps:$4 sm:$0xff]   ;;  %v1013_v19 = vld [vmem:[%s1244_s1 + $0x18] ss:$12 sps:$4 sm:$0xff]   ;;  %v1032_v22 = vld [vmem:[%s1244_s1] ss:$12 sps:$4 sm:$0xff]  }
   0x7   :  { %202 = vmatpush1.bf16.msra.mxu0 %v927_v5  ;;  %v1006_v18 = vld [vmem:[%s1244_s1 + $0x68] ss:$12 sps:$4 sm:$0xff]   ;;  %v1019_v20 = vld [vmem:[%s1244_s1 + $0x4] ss:$12 sps:$4 sm:$0xff]   ;;  %v1048_v24 = vld [vmem:[%s1244_s1 + $0x20] ss:$12 sps:$4 sm:$0xff]  }
   0x8   :  { %203 = vmatprep.subr.bf16.mxu0 %v933_v6  ;;  %v1025_v21 = vld [vmem:[%s1244_s1 + $0x50] ss:$12 sps:$4 sm:$0xff]   ;;  %v1039_v23 = vld [vmem:[%s1244_s1 + $0x38] ss:$12 sps:$4 sm:$0xff]   ;;  %v1058_v26 = vld [vmem:[%s1244_s1 + $0x8] ss:$12 sps:$4 sm:$0xff]  }
   0x9   :  { %726 = vmatpush3.bf16.msra.mxu1 %v968_v12  ;;  %v57_v28 = vshrl.u32 %v56_v27, 7  ;;  %v52_v30 = vld [vmem:[%s1245_s2] sm:$0x7]  ;;  %v281_v42 = vld [vmem:[%s1246_s0 + $0x8] sm:$0xff]  ;;  %v282_v58 = vld [vmem:[%s1246_s0 + $0x10] sm:$0xff] }
   0xa   :  { %727 = vmatprep.subr.bf16.mxu1 %v879_v1  ;;  %v280_v34 = vld [vmem:[%s1246_s0] sm:$0xff] }
   0xb   :  { %204 = vmatpush1.bf16.msra.mxu0 %v939_v7  ;;  %v58_v29 = vsub.s32 0, %v57_v28  ;;  %v62_v32 = vsub.s32 1, %v57_v28  ;;  %v66_v52 = vsub.s32 2, %v57_v28 }
   0xc   :  { %205 = vmatprep.subr.bf16.mxu0 %v945_v8 }
   0xd   :  { %728 = vmatpush3.bf16.msra.mxu1 %v987_v15  ;;  %v1098_v31 = vrot.slane %v52_v30, %v58_v29  ;;  %v1104_v36 = vrot.slane %v52_v30, %v62_v32  ;;  %v1110_v53 = vrot.slane %v52_v30, %v66_v52  ;;  %v669_v32 = vld [vmem:[%s1246_s0 + $0x18] sm:$0xff] }
   0xe   :  { %729 = vmatprep.subr.bf16.mxu1 %v879_v1 }
   0xf   :  { %206 = vmatpush1.bf16.msra.mxu0 %v950_v9 }
  0x10   :  { %207 = vmatprep.subr.bf16.mxu0 %v962_v11 }
  0x11   :  { %730 = vmatpush3.bf16.msra.mxu1 %v1006_v18 }
  0x12   :  { %731 = vmatprep.subr.bf16.mxu1 %v879_v1 }
  0x13   :  { %208 = vmatpush1.bf16.msra.mxu0 %v975_v13 }
  0x14   :  { %209 = vmatprep.subr.bf16.mxu0 %v981_v14 }
  0x15   :  { %732 = vmatpush3.bf16.msra.mxu1 %v1025_v21 }
  0x16   :  { %733 = vmatprep.subr.bf16.mxu1 %v879_v1 }
  0x17   :  { %210 = vmatpush1.bf16.msra.mxu0 %v994_v16 }
  0x18   :  { %211 = vmatprep.subr.bf16.mxu0 %v1000_v17 }
  0x19   :  { %734 = vmatpush3.bf16.msra.mxu1 %v1039_v23 }
  0x1a   :  { %735 = vmatprep.subr.bf16.mxu1 %v879_v1 }
  0x1b   :  { %212 = vmatpush1.bf16.msra.mxu0 %v1013_v19 }
  0x1c   :  { %213 = vmatprep.subr.bf16.mxu0 %v1019_v20 }
  0x1d   :  { %736 = vmatpush3.bf16.msra.mxu1 %v1048_v24 }
  0x1e   :  { %737 = vmatprep.subr.bf16.mxu1 %v879_v1 }
  0x1f   :  { %214 = vmatpush1.bf16.msra.mxu0 %v1032_v22 }
  0x20   :  { %308 = vmatprep.subr.bf16.mxu0 %v906_v0 }
  0x21   :  { %738 = vmatpush3.bf16.msra.mxu1 %v1058_v26 }
  0x22   :  { %232 = vmatmul.mubr.bf16.vlgmr.msra.gmra.mxu0 %v882_v25  ;;  %743 = vmatprep.subr.bf16.mxu1 %v879_v1 }
  0x23   :  { %309 = vmatpush1.bf16.msra.mxu0 %v913_v3  ;;  %340 = vmatprep.mubr.bf16.mxu0 %v880_v2 }
  0x24   :  { %310 = vmatprep.subr.bf16.mxu0 %v921_v4  ;;  %740 = vmatmul.mubr.bf16.vlgmr.msra.gmra.mxu1 %v882_v25 }
  0x25   :  { %744 = vmatpush3.bf16.msra.mxu1 %v956_v10  ;;  %759 = vmatprep.mubr.msk.bf16.mxu1 %vm881_vm0, %v879_v1 }
  0x26   :  { %745 = vmatprep.subr.bf16.mxu1 %v879_v1 }
  0x27   :  { %311 = vmatpush1.bf16.msra.mxu0 %v927_v5 }
  0x28   :  { %312 = vmatprep.subr.bf16.mxu0 %v933_v6 }
  0x29   :  { %746 = vmatpush3.bf16.msra.mxu1 %v968_v12 }
  0x2a   :  { %747 = vmatprep.subr.bf16.mxu1 %v879_v1 }
  0x2b   :  { %313 = vmatpush1.bf16.msra.mxu0 %v939_v7 }
  0x2c   :  { %314 = vmatprep.subr.bf16.mxu0 %v945_v8 }
  0x2d   :  { %748 = vmatpush3.bf16.msra.mxu1 %v987_v15 }
  0x2e   :  { %749 = vmatprep.subr.bf16.mxu1 %v879_v1 }
  0x2f   :  { %315 = vmatpush1.bf16.msra.mxu0 %v950_v9 }
  0x30   :  { %316 = vmatprep.subr.bf16.mxu0 %v962_v11 }
  0x31   :  { %750 = vmatpush3.bf16.msra.mxu1 %v1006_v18 }
  0x32   :  { %751 = vmatprep.subr.bf16.mxu1 %v879_v1 }
  0x33   :  { %317 = vmatpush1.bf16.msra.mxu0 %v975_v13 }
  0x34   :  { %318 = vmatprep.subr.bf16.mxu0 %v981_v14 }
  0x35   :  { %752 = vmatpush3.bf16.msra.mxu1 %v1025_v21 }
  0x36   :  { %753 = vmatprep.subr.bf16.mxu1 %v879_v1 }
  0x37   :  { %319 = vmatpush1.bf16.msra.mxu0 %v994_v16 }
  0x38   :  { %320 = vmatprep.subr.bf16.mxu0 %v1000_v17 }
  0x39   :  { %754 = vmatpush3.bf16.msra.mxu1 %v1039_v23 }
  0x3a   :  { %755 = vmatprep.subr.bf16.mxu1 %v879_v1 }
  0x3b   :  { %321 = vmatpush1.bf16.msra.mxu0 %v1013_v19 }
  0x3c   :  { %322 = vmatprep.subr.bf16.mxu0 %v1019_v20 }
  0x3d   :  { %756 = vmatpush3.bf16.msra.mxu1 %v1048_v24 }
  0x3e   :  { %757 = vmatprep.subr.bf16.mxu1 %v879_v1 }
  0x3f   :  { %323 = vmatpush1.bf16.msra.mxu0 %v1032_v22 }
  0x40   :  { %419 = vmatprep.subr.bf16.mxu0 %v906_v0 }
  0x41   :  { %758 = vmatpush3.bf16.msra.mxu1 %v1058_v26 }
  0x42   :  { %763 = vmatprep.subr.bf16.mxu1 %v879_v1 }
  0xe2   :  { %v233_v33 = vpop.f32.mrf.mxu0 }
  0xe3   :  { %v234_v35 = vadd.f32 %v233_v33, %v1098_v31 }
  0xe4   :  { %v235_v37 = vpop.f32.mrf.mxu0  ;;  %v274_v45 = vpop.f32.mrf.mxu1 }
  0xe5   :  { %v283_v38 = vadd.f32 %v280_v34, %v234_v35  ;;  %v236_v41 = vadd.f32 %v235_v37, %v1104_v36  ;;  %v275_v56 = vadd.f32 %v274_v45, %v1110_v53 }
  0xe6   :  { %v237_v39 = vpop.f32.mrf.mxu0  ;;  %v741_v46 = vpop.f32.mrf.mxu1 }
  0xe7   :  { %v667_v40 = vmul.f32 -1.442695, %v283_v38  ;;  %v290_v44 = vadd.f32 %v281_v42, %v236_v41 }
  0xe8   :  { %v238_v43 = vpop.f32.mrf.mxu0  ;;  %v277_v48 = vpop.f32.mrf.mxu1 }
  0xe9   :  { %839 = vpow2.f32 %v667_v40  ;;  %v668_v47 = vmul.f32 -1.442695, %v290_v44 }
  0xea   :  { %v742_v49 = vpop.f32.mrf.mxu1 }
  0xeb   :  { %841 = vpow2.f32 %v668_v47 }
  0xf6   :  { %v840_v50 = vpop.eup %839 }
  0xf7   :  { %v287_v51 = vadd.f32 1.0, %v840_v50 }
  0xf8   :  { %v842_v54 = vpop.eup %841 }
  0xf9   :  { %843 = vrcp.f32 %v287_v51  ;;  %v294_v55 = vadd.f32 1.0, %v842_v54  ;;  %v671_v54 = vld [vmem:[%s1246_s0 + $0x28] sm:$0xff] }
  0xfb   :  { %845 = vrcp.f32 %v294_v55 }
 0x106   :  { %v844_v57 = vpop.eup %843 }
 0x107   :  { %v297_v59 = vmul.f32 %v844_v57, %v275_v56 }
 0x108   :  { %v846_v61 = vpop.eup %845 }
 0x109   :  { %v298_v60 = vadd.f32 %v297_v59, %v282_v58  ;;  %v300_v62 = vsub.f32 1.0, %v846_v61  ;;  %v302_v27 = vmul.f32 0.0, %v846_v61 }
 0x10b   :  { %847 = vtanh.f32 %v298_v60 }
 0x118   :  { %v848_v63 = vpop.eup %847 }
 0x119   :  { %v301_v25 = vmul.f32 %v848_v63, %v300_v62 }
 0x11b   :  { %v1116_v28 = vadd.f32 %v302_v27, %v301_v25 }
 0x11d   :  { %305 = vst [vmem:[%s1247_s3] sm:$0xff] %v1116_v28  ;;  %v307_v29 = vpack.c.bf16 %v1116_v28, %v1116_v28 }
 0x11f   :  { %341 = vmatmul.mubr.bf16.vlgmr.msra.gmra.mxu0 %v307_v29  ;;  %760 = vmatmul.mubr.bf16.vlgmr.msra.gmra.mxu1 %v307_v29 }
 0x120   :  { %420 = vmatpush1.bf16.msra.mxu0 %v913_v3  ;;  %764 = vmatpush3.bf16.msra.mxu1 %v956_v10 }
 0x121   :  { %421 = vmatprep.subr.bf16.mxu0 %v921_v4  ;;  %765 = vmatprep.subr.bf16.mxu1 %v879_v1 }
 0x122   :  { %451 = vmatprep.mubr.bf16.mxu0 %v880_v2  ;;  %779 = vmatprep.mubr.msk.bf16.mxu1 %vm881_vm0, %v879_v1 }
 0x124   :  { %422 = vmatpush1.bf16.msra.mxu0 %v927_v5  ;;  %766 = vmatpush3.bf16.msra.mxu1 %v968_v12 }
 0x125   :  { %423 = vmatprep.subr.bf16.mxu0 %v933_v6  ;;  %767 = vmatprep.subr.bf16.mxu1 %v879_v1 }
 0x128   :  { %424 = vmatpush1.bf16.msra.mxu0 %v939_v7  ;;  %768 = vmatpush3.bf16.msra.mxu1 %v987_v15 }
 0x129   :  { %425 = vmatprep.subr.bf16.mxu0 %v945_v8  ;;  %769 = vmatprep.subr.bf16.mxu1 %v879_v1 }
 0x12c   :  { %426 = vmatpush1.bf16.msra.mxu0 %v950_v9  ;;  %770 = vmatpush3.bf16.msra.mxu1 %v1006_v18 }
 0x12d   :  { %427 = vmatprep.subr.bf16.mxu0 %v962_v11  ;;  %771 = vmatprep.subr.bf16.mxu1 %v879_v1 }
 0x130   :  { %428 = vmatpush1.bf16.msra.mxu0 %v975_v13  ;;  %772 = vmatpush3.bf16.msra.mxu1 %v1025_v21 }
 0x131   :  { %429 = vmatprep.subr.bf16.mxu0 %v981_v14  ;;  %773 = vmatprep.subr.bf16.mxu1 %v879_v1 }
 0x134   :  { %430 = vmatpush1.bf16.msra.mxu0 %v994_v16  ;;  %774 = vmatpush3.bf16.msra.mxu1 %v1039_v23 }
 0x135   :  { %431 = vmatprep.subr.bf16.mxu0 %v1000_v17  ;;  %775 = vmatprep.subr.bf16.mxu1 %v879_v1 }
 0x138   :  { %432 = vmatpush1.bf16.msra.mxu0 %v1013_v19  ;;  %776 = vmatpush3.bf16.msra.mxu1 %v1048_v24 }
 0x139   :  { %433 = vmatprep.subr.bf16.mxu0 %v1019_v20  ;;  %777 = vmatprep.subr.bf16.mxu1 %v879_v1 }
 0x13c   :  { %434 = vmatpush1.bf16.msra.mxu0 %v1032_v22  ;;  %778 = vmatpush3.bf16.msra.mxu1 %v1058_v26 }
 0x13d   :  { %530 = vmatprep.subr.bf16.mxu0 %v906_v0  ;;  %783 = vmatprep.subr.bf16.mxu1 %v879_v1  ;;  %v670_v0 = vld [vmem:[%s1246_s0 + $0x20] sm:$0xff] }
 0x1df   :  { %v342_v30 = vpop.f32.mrf.mxu0  ;;  %v383_v33 = vpop.f32.mrf.mxu1 }
 0x1e0   :  { %v343_v34 = vadd.f32 %v342_v30, %v1098_v31  ;;  %v384_v51 = vadd.f32 %v383_v33, %v1110_v53 }
 0x1e1   :  { %v344_v35 = vpop.f32.mrf.mxu0  ;;  %v761_v37 = vpop.f32.mrf.mxu1 }
 0x1e2   :  { %v393_v38 = vadd.f32 %v669_v32, %v343_v34  ;;  %v345_v42 = vadd.f32 %v344_v35, %v1104_v36  ;;  %v681_v35 = vld [vmem:[%s1246_s0 + $0x48] sm:$0xff] }
 0x1e3   :  { %v346_v39 = vpop.f32.mrf.mxu0  ;;  %v386_v40 = vpop.f32.mrf.mxu1 }
 0x1e4   :  { %v672_v41 = vmul.f32 -1.442695, %v393_v38  ;;  %v400_v45 = vadd.f32 %v670_v0, %v345_v42 }
 0x1e5   :  { %v347_v43 = vpop.f32.mrf.mxu0  ;;  %v762_v44 = vpop.f32.mrf.mxu1 }
 0x1e6   :  { %849 = vpow2.f32 %v672_v41  ;;  %v673_v46 = vmul.f32 -1.442695, %v400_v45  ;;  %v682_v45 = vld [vmem:[%s1246_s0 + $0x50] sm:$0xff] }
 0x1e8   :  { %851 = vpow2.f32 %v673_v46 }
 0x1f3   :  { %v850_v47 = vpop.eup %849 }
 0x1f4   :  { %v397_v48 = vadd.f32 1.0, %v850_v47 }
 0x1f5   :  { %v852_v49 = vpop.eup %851 }
 0x1f6   :  { %853 = vrcp.f32 %v397_v48  ;;  %v404_v50 = vadd.f32 1.0, %v852_v49 }
 0x1f8   :  { %855 = vrcp.f32 %v404_v50 }
 0x203   :  { %v854_v52 = vpop.eup %853 }
 0x204   :  { %v407_v55 = vmul.f32 %v854_v52, %v384_v51 }
 0x205   :  { %v856_v57 = vpop.eup %855 }
 0x206   :  { %v408_v56 = vadd.f32 %v671_v54, %v407_v55  ;;  %v410_v58 = vsub.f32 1.0, %v856_v57  ;;  %v412_v61 = vmul.f32 %v856_v57, %v1116_v28 }
 0x208   :  { %857 = vtanh.f32 %v408_v56 }
 0x215   :  { %v858_v59 = vpop.eup %857 }
 0x216   :  { %v411_v60 = vmul.f32 %v858_v59, %v410_v58 }
 0x218   :  { %v1172_v62 = vadd.f32 %v412_v61, %v411_v60 }
 0x21a   :  { %674 = vst [vmem:[%s1247_s3 + $0x8] sm:$0xff] %v1172_v62  ;;  %v418_v63 = vpack.c.bf16 %v1172_v62, %v1172_v62 }
 0x21c   :  { %452 = vmatmul.mubr.bf16.vlgmr.msra.gmra.mxu0 %v418_v63  ;;  %780 = vmatmul.mubr.bf16.vlgmr.msra.gmra.mxu1 %v418_v63 }
 0x21d   :  { %531 = vmatpush1.bf16.msra.mxu0 %v913_v3  ;;  %784 = vmatpush3.bf16.msra.mxu1 %v956_v10  ;;  %v675_v3 = vld [vmem:[%s1246_s0 + $0x30] sm:$0xff] }
 0x21e   :  { %532 = vmatprep.subr.bf16.mxu0 %v921_v4  ;;  %785 = vmatprep.subr.bf16.mxu1 %v879_v1 }
 0x21f   :  { %562 = vmatprep.mubr.bf16.mxu0 %v880_v2  ;;  %799 = vmatprep.mubr.msk.bf16.mxu1 %vm881_vm0, %v879_v1 }
 0x221   :  { %533 = vmatpush1.bf16.msra.mxu0 %v927_v5  ;;  %786 = vmatpush3.bf16.msra.mxu1 %v968_v12  ;;  %v676_v12 = vld [vmem:[%s1246_s0 + $0x38] sm:$0xff] }
 0x222   :  { %534 = vmatprep.subr.bf16.mxu0 %v933_v6  ;;  %787 = vmatprep.subr.bf16.mxu1 %v879_v1 }
 0x225   :  { %535 = vmatpush1.bf16.msra.mxu0 %v939_v7  ;;  %788 = vmatpush3.bf16.msra.mxu1 %v987_v15 }
 0x226   :  { %536 = vmatprep.subr.bf16.mxu0 %v945_v8  ;;  %789 = vmatprep.subr.bf16.mxu1 %v879_v1 }
 0x229   :  { %537 = vmatpush1.bf16.msra.mxu0 %v950_v9  ;;  %790 = vmatpush3.bf16.msra.mxu1 %v1006_v18 }
 0x22a   :  { %538 = vmatprep.subr.bf16.mxu0 %v962_v11  ;;  %791 = vmatprep.subr.bf16.mxu1 %v879_v1 }
 0x22d   :  { %539 = vmatpush1.bf16.msra.mxu0 %v975_v13  ;;  %792 = vmatpush3.bf16.msra.mxu1 %v1025_v21 }
 0x22e   :  { %540 = vmatprep.subr.bf16.mxu0 %v981_v14  ;;  %793 = vmatprep.subr.bf16.mxu1 %v879_v1 }
 0x231   :  { %541 = vmatpush1.bf16.msra.mxu0 %v994_v16  ;;  %794 = vmatpush3.bf16.msra.mxu1 %v1039_v23  ;;  %v677_v23 = vld [vmem:[%s1246_s0 + $0x40] sm:$0xff] }
 0x232   :  { %542 = vmatprep.subr.bf16.mxu0 %v1000_v17  ;;  %795 = vmatprep.subr.bf16.mxu1 %v879_v1 }
 0x235   :  { %543 = vmatpush1.bf16.msra.mxu0 %v1013_v19  ;;  %796 = vmatpush3.bf16.msra.mxu1 %v1048_v24 }
 0x236   :  { %544 = vmatprep.subr.bf16.mxu0 %v1019_v20  ;;  %797 = vmatprep.subr.bf16.mxu1 %v879_v1 }
 0x239   :  { %545 = vmatpush1.bf16.msra.mxu0 %v1032_v22  ;;  %798 = vmatpush3.bf16.msra.mxu1 %v1058_v26 }
 0x2dc   :  { %v453_v2 = vpop.f32.mrf.mxu0  ;;  %v494_v4 = vpop.f32.mrf.mxu1 }
 0x2dd   :  { %v454_v5 = vadd.f32 %v453_v2, %v1098_v31  ;;  %v495_v21 = vadd.f32 %v494_v4, %v1110_v53 }
 0x2de   :  { %v455_v6 = vpop.f32.mrf.mxu0  ;;  %v781_v7 = vpop.f32.mrf.mxu1 }
 0x2df   :  { %v504_v8 = vadd.f32 %v675_v3, %v454_v5  ;;  %v456_v1 = vadd.f32 %v455_v6, %v1104_v36 }
 0x2e0   :  { %v457_v9 = vpop.f32.mrf.mxu0  ;;  %v497_v10 = vpop.f32.mrf.mxu1 }
 0x2e1   :  { %v678_v11 = vmul.f32 -1.442695, %v504_v8  ;;  %v511_v15 = vadd.f32 %v676_v12, %v456_v1 }
 0x2e2   :  { %v458_v13 = vpop.f32.mrf.mxu0  ;;  %v782_v14 = vpop.f32.mrf.mxu1 }
 0x2e3   :  { %859 = vpow2.f32 %v678_v11  ;;  %v679_v16 = vmul.f32 -1.442695, %v511_v15 }
 0x2e5   :  { %861 = vpow2.f32 %v679_v16 }
 0x2f0   :  { %v860_v17 = vpop.eup %859 }
 0x2f1   :  { %v508_v18 = vadd.f32 1.0, %v860_v17 }
 0x2f2   :  { %v862_v19 = vpop.eup %861 }
 0x2f3   :  { %863 = vrcp.f32 %v508_v18  ;;  %v515_v20 = vadd.f32 1.0, %v862_v19 }
 0x2f5   :  { %865 = vrcp.f32 %v515_v20 }
 0x300   :  { %v864_v22 = vpop.eup %863 }
 0x301   :  { %v518_v24 = vmul.f32 %v864_v22, %v495_v21 }
 0x302   :  { %v866_v25 = vpop.eup %865 }
 0x303   :  { %v519_v26 = vadd.f32 %v677_v23, %v518_v24  ;;  %v521_v27 = vsub.f32 1.0, %v866_v25  ;;  %v523_v30 = vmul.f32 %v866_v25, %v1172_v62 }
 0x305   :  { %867 = vtanh.f32 %v519_v26 }
 0x312   :  { %v868_v28 = vpop.eup %867 }
 0x313   :  { %v522_v29 = vmul.f32 %v868_v28, %v521_v27 }
 0x315   :  { %v524_v32 = vadd.f32 %v523_v30, %v522_v29 }
 0x317   :  { %680 = vst [vmem:[%s1247_s3 + $0x10] sm:$0xff] %v524_v32  ;;  %v529_v33 = vpack.c.bf16 %v524_v32, %v524_v32 }
 0x319   :  { %563 = vmatmul.mubr.bf16.vlgmr.msra.gmra.mxu0 %v529_v33  ;;  %800 = vmatmul.mubr.bf16.vlgmr.msra.gmra.mxu1 %v529_v33 }
 0x3d9   :  { %v564_v34 = vpop.f32.mrf.mxu0  ;;  %v605_v37 = vpop.f32.mrf.mxu1 }
 0x3da   :  { %v565_v38 = vadd.f32 %v564_v34, %v1098_v31  ;;  %v606_v54 = vadd.f32 %v605_v37, %v1110_v53 }
 0x3db   :  { %v566_v39 = vpop.f32.mrf.mxu0  ;;  %v801_v40 = vpop.f32.mrf.mxu1 }
 0x3dc   :  { %v615_v41 = vadd.f32 %v681_v35, %v565_v38  ;;  %v567_v44 = vadd.f32 %v566_v39, %v1104_v36  ;;  %v683_v36 = vld [vmem:[%s1246_s0 + $0x58] sm:$0xff] }
 0x3dd   :  { %v568_v42 = vpop.f32.mrf.mxu0  ;;  %v608_v0 = vpop.f32.mrf.mxu1 }
 0x3de   :  { %v684_v43 = vmul.f32 -1.442695, %v615_v41  ;;  %v622_v48 = vadd.f32 %v682_v45, %v567_v44 }
 0x3df   :  { %v569_v46 = vpop.f32.mrf.mxu0  ;;  %v802_v47 = vpop.f32.mrf.mxu1 }
 0x3e0   :  { %869 = vpow2.f32 %v684_v43  ;;  %v685_v49 = vmul.f32 -1.442695, %v622_v48 }
 0x3e2   :  { %871 = vpow2.f32 %v685_v49 }
 0x3ed   :  { %v870_v50 = vpop.eup %869 }
 0x3ee   :  { %v619_v31 = vadd.f32 1.0, %v870_v50 }
 0x3ef   :  { %v872_v51 = vpop.eup %871 }
 0x3f0   :  { %873 = vrcp.f32 %v619_v31  ;;  %v626_v52 = vadd.f32 1.0, %v872_v51 }
 0x3f2   :  { %875 = vrcp.f32 %v626_v52 }
 0x3fd   :  { %v874_v55 = vpop.eup %873 }
 0x3fe   :  { %v629_v56 = vmul.f32 %v874_v55, %v606_v54 }
 0x3ff   :  { %v876_v58 = vpop.eup %875 }
 0x400   :  { %v630_v57 = vadd.f32 %v683_v36, %v629_v56  ;;  %v632_v59 = vsub.f32 1.0, %v876_v58  ;;  %v634_v62 = vmul.f32 %v876_v58, %v524_v32 }
 0x402   :  { %877 = vtanh.f32 %v630_v57 }
 0x40f   :  { %v878_v60 = vpop.eup %877 }
 0x410   :  { %v633_v61 = vmul.f32 %v878_v60, %v632_v59 }
 0x412   :  { %v635_v63 = vadd.f32 %v634_v62, %v633_v61 }
 0x414   :  { %686 = vst [vmem:[%s1247_s3 + $0x18] sm:$0xff] %v635_v63 }

// kernel: encoder_drnn_forward.2
= control target key start
LH: loop header
LB: loop body
LE: loop exit
PB: predicated region body
PF: predicated region fallthrough
CT: control target
= control target key end

     0   :  { %v1515_v1 = vmov 0.0   ;;  %v1516_v2 = vmov 0   ;;  %vm1517_vm0 = vmmov 0   ;;  %v1518_v25 = vmov 0.0|0.0   ;;  %s2128_s1 = inlined_call_operand.vmem [shape: bf16[128,384], index: 1, kind: input, shape index: {}]   ;;  %s2129_s2 = inlined_call_operand.vmem [shape: f32[1,384], index: 2, kind: input, shape index: {}]   ;;  %s2130_s0 = inlined_call_operand.vmem [shape: f32[8,8,384], index: 0, kind: input, shape index: {}]   ;;  %s2131_s3 = inlined_call_operand.vmem [shape: f32[8,8,128], index: 3, kind: output, shape index: {}]  }
   0x1   :  { %v1542_v0 = vld [vmem:[%s2128_s1 + $0xac] ss:$12 sps:$4 sm:$0xff]   ;;  %1227 = vmatprep.subr.bf16.mxu1 %v1515_v1  ;;  %231 = vmatprep.mubr.bf16.mxu0 %v1516_v2  ;;  %v1549_v3 = vld [vmem:[%s2128_s1 + $0xa8] ss:$12 sps:$4 sm:$0xff]   ;;  %v1563_v5 = vld [vmem:[%s2128_s1 + $0x90] ss:$12 sps:$4 sm:$0xff]   ;;  %v56_v27 = vlaneseq }
   0x2   :  { %1243 = vmatprep.mubr.msk.bf16.mxu1 %vm1517_vm0, %v1515_v1  ;;  %199 = vmatprep.subr.bf16.mxu0 %v1542_v0  ;;  %v1557_v4 = vld [vmem:[%s2128_s1 + $0x94] ss:$12 sps:$4 sm:$0xff]   ;;  %v1569_v6 = vld [vmem:[%s2128_s1 + $0x7c] ss:$12 sps:$4 sm:$0xff]   ;;  %v1575_v7 = vld [vmem:[%s2128_s1 + $0x78] ss:$12 sps:$4 sm:$0xff]  }
   0x3   :  { %200 = vmatpush1.bf16.msra.mxu0 %v1549_v3  ;;  %v1581_v8 = vld [vmem:[%s2128_s1 + $0x64] ss:$12 sps:$4 sm:$0xff]   ;;  %v1586_v9 = vld [vmem:[%s2128_s1 + $0x60] ss:$12 sps:$4 sm:$0xff]   ;;  %v1611_v13 = vld [vmem:[%s2128_s1 + $0x48] ss:$12 sps:$4 sm:$0xff]  }
   0x4   :  { %201 = vmatprep.subr.bf16.mxu0 %v1557_v4  ;;  %v1592_v10 = vld [vmem:[%s2128_s1 + $0xb0] ss:$12 sps:$4 sm:$0xff]   ;;  %v1598_v11 = vld [vmem:[%s2128_s1 + $0x4c] ss:$12 sps:$4 sm:$0xff]   ;;  %v1617_v14 = vld [vmem:[%s2128_s1 + $0x34] ss:$12 sps:$4 sm:$0xff]  }
   0x5   :  { %1228 = vmatpush3.bf16.msra.mxu1 %v1592_v10  ;;  %v1604_v12 = vld [vmem:[%s2128_s1 + $0x98] ss:$12 sps:$4 sm:$0xff]   ;;  %v1623_v15 = vld [vmem:[%s2128_s1 + $0x80] ss:$12 sps:$4 sm:$0xff]   ;;  %v1630_v16 = vld [vmem:[%s2128_s1 + $0x30] ss:$12 sps:$4 sm:$0xff]  }
   0x6   :  { %1229 = vmatprep.subr.bf16.mxu1 %v1515_v1  ;;  %v1636_v17 = vld [vmem:[%s2128_s1 + $0x1c] ss:$12 sps:$4 sm:$0xff]   ;;  %v1649_v19 = vld [vmem:[%s2128_s1 + $0x18] ss:$12 sps:$4 sm:$0xff]   ;;  %v1668_v22 = vld [vmem:[%s2128_s1] ss:$12 sps:$4 sm:$0xff]  }
   0x7   :  { %202 = vmatpush1.bf16.msra.mxu0 %v1563_v5  ;;  %v1642_v18 = vld [vmem:[%s2128_s1 + $0x68] ss:$12 sps:$4 sm:$0xff]   ;;  %v1655_v20 = vld [vmem:[%s2128_s1 + $0x4] ss:$12 sps:$4 sm:$0xff]   ;;  %v1684_v24 = vld [vmem:[%s2128_s1 + $0x20] ss:$12 sps:$4 sm:$0xff]  }
   0x8   :  { %203 = vmatprep.subr.bf16.mxu0 %v1569_v6  ;;  %v1661_v21 = vld [vmem:[%s2128_s1 + $0x50] ss:$12 sps:$4 sm:$0xff]   ;;  %v1675_v23 = vld [vmem:[%s2128_s1 + $0x38] ss:$12 sps:$4 sm:$0xff]   ;;  %v1694_v26 = vld [vmem:[%s2128_s1 + $0x8] ss:$12 sps:$4 sm:$0xff]  }
   0x9   :  { %1230 = vmatpush3.bf16.msra.mxu1 %v1604_v12  ;;  %v57_v28 = vshrl.u32 %v56_v27, 7  ;;  %v52_v30 = vld [vmem:[%s2129_s2] sm:$0x7]  ;;  %v281_v42 = vld [vmem:[%s2130_s0 + $0x8] sm:$0xff]  ;;  %v282_v58 = vld [vmem:[%s2130_s0 + $0x10] sm:$0xff] }
   0xa   :  { %1231 = vmatprep.subr.bf16.mxu1 %v1515_v1  ;;  %v280_v34 = vld [vmem:[%s2130_s0] sm:$0xff] }
   0xb   :  { %204 = vmatpush1.bf16.msra.mxu0 %v1575_v7  ;;  %v58_v29 = vsub.s32 0, %v57_v28  ;;  %v62_v32 = vsub.s32 1, %v57_v28  ;;  %v66_v52 = vsub.s32 2, %v57_v28 }
   0xc   :  { %205 = vmatprep.subr.bf16.mxu0 %v1581_v8 }
   0xd   :  { %1232 = vmatpush3.bf16.msra.mxu1 %v1623_v15  ;;  %v1734_v31 = vrot.slane %v52_v30, %v58_v29  ;;  %v1740_v36 = vrot.slane %v52_v30, %v62_v32  ;;  %v1746_v53 = vrot.slane %v52_v30, %v66_v52  ;;  %v1113_v32 = vld [vmem:[%s2130_s0 + $0x18] sm:$0xff] }
   0xe   :  { %1233 = vmatprep.subr.bf16.mxu1 %v1515_v1 }
   0xf   :  { %206 = vmatpush1.bf16.msra.mxu0 %v1586_v9 }
  0x10   :  { %207 = vmatprep.subr.bf16.mxu0 %v1598_v11 }
  0x11   :  { %1234 = vmatpush3.bf16.msra.mxu1 %v1642_v18 }
  0x12   :  { %1235 = vmatprep.subr.bf16.mxu1 %v1515_v1 }
  0x13   :  { %208 = vmatpush1.bf16.msra.mxu0 %v1611_v13 }
  0x14   :  { %209 = vmatprep.subr.bf16.mxu0 %v1617_v14 }
  0x15   :  { %1236 = vmatpush3.bf16.msra.mxu1 %v1661_v21 }
  0x16   :  { %1237 = vmatprep.subr.bf16.mxu1 %v1515_v1 }
  0x17   :  { %210 = vmatpush1.bf16.msra.mxu0 %v1630_v16 }
  0x18   :  { %211 = vmatprep.subr.bf16.mxu0 %v1636_v17 }
  0x19   :  { %1238 = vmatpush3.bf16.msra.mxu1 %v1675_v23 }
  0x1a   :  { %1239 = vmatprep.subr.bf16.mxu1 %v1515_v1 }
  0x1b   :  { %212 = vmatpush1.bf16.msra.mxu0 %v1649_v19 }
  0x1c   :  { %213 = vmatprep.subr.bf16.mxu0 %v1655_v20 }
  0x1d   :  { %1240 = vmatpush3.bf16.msra.mxu1 %v1684_v24 }
  0x1e   :  { %1241 = vmatprep.subr.bf16.mxu1 %v1515_v1 }
  0x1f   :  { %214 = vmatpush1.bf16.msra.mxu0 %v1668_v22 }
  0x20   :  { %308 = vmatprep.subr.bf16.mxu0 %v1542_v0 }
  0x21   :  { %1242 = vmatpush3.bf16.msra.mxu1 %v1694_v26 }
  0x22   :  { %232 = vmatmul.mubr.bf16.vlgmr.msra.gmra.mxu0 %v1518_v25  ;;  %1247 = vmatprep.subr.bf16.mxu1 %v1515_v1 }
  0x23   :  { %309 = vmatpush1.bf16.msra.mxu0 %v1549_v3  ;;  %340 = vmatprep.mubr.bf16.mxu0 %v1516_v2 }
  0x24   :  { %310 = vmatprep.subr.bf16.mxu0 %v1557_v4  ;;  %1244 = vmatmul.mubr.bf16.vlgmr.msra.gmra.mxu1 %v1518_v25 }
  0x25   :  { %1248 = vmatpush3.bf16.msra.mxu1 %v1592_v10  ;;  %1263 = vmatprep.mubr.msk.bf16.mxu1 %vm1517_vm0, %v1515_v1 }
  0x26   :  { %1249 = vmatprep.subr.bf16.mxu1 %v1515_v1 }
  0x27   :  { %311 = vmatpush1.bf16.msra.mxu0 %v1563_v5 }
  0x28   :  { %312 = vmatprep.subr.bf16.mxu0 %v1569_v6 }
  0x29   :  { %1250 = vmatpush3.bf16.msra.mxu1 %v1604_v12 }
  0x2a   :  { %1251 = vmatprep.subr.bf16.mxu1 %v1515_v1 }
  0x2b   :  { %313 = vmatpush1.bf16.msra.mxu0 %v1575_v7 }
  0x2c   :  { %314 = vmatprep.subr.bf16.mxu0 %v1581_v8 }
  0x2d   :  { %1252 = vmatpush3.bf16.msra.mxu1 %v1623_v15 }
  0x2e   :  { %1253 = vmatprep.subr.bf16.mxu1 %v1515_v1 }
  0x2f   :  { %315 = vmatpush1.bf16.msra.mxu0 %v1586_v9 }
  0x30   :  { %316 = vmatprep.subr.bf16.mxu0 %v1598_v11 }
  0x31   :  { %1254 = vmatpush3.bf16.msra.mxu1 %v1642_v18 }
  0x32   :  { %1255 = vmatprep.subr.bf16.mxu1 %v1515_v1 }
  0x33   :  { %317 = vmatpush1.bf16.msra.mxu0 %v1611_v13 }
  0x34   :  { %318 = vmatprep.subr.bf16.mxu0 %v1617_v14 }
  0x35   :  { %1256 = vmatpush3.bf16.msra.mxu1 %v1661_v21 }
  0x36   :  { %1257 = vmatprep.subr.bf16.mxu1 %v1515_v1 }
  0x37   :  { %319 = vmatpush1.bf16.msra.mxu0 %v1630_v16 }
  0x38   :  { %320 = vmatprep.subr.bf16.mxu0 %v1636_v17 }
  0x39   :  { %1258 = vmatpush3.bf16.msra.mxu1 %v1675_v23 }
  0x3a   :  { %1259 = vmatprep.subr.bf16.mxu1 %v1515_v1 }
  0x3b   :  { %321 = vmatpush1.bf16.msra.mxu0 %v1649_v19 }
  0x3c   :  { %322 = vmatprep.subr.bf16.mxu0 %v1655_v20 }
  0x3d   :  { %1260 = vmatpush3.bf16.msra.mxu1 %v1684_v24 }
  0x3e   :  { %1261 = vmatprep.subr.bf16.mxu1 %v1515_v1 }
  0x3f   :  { %323 = vmatpush1.bf16.msra.mxu0 %v1668_v22 }
  0x40   :  { %419 = vmatprep.subr.bf16.mxu0 %v1542_v0 }
  0x41   :  { %1262 = vmatpush3.bf16.msra.mxu1 %v1694_v26 }
  0x42   :  { %1267 = vmatprep.subr.bf16.mxu1 %v1515_v1 }
  0xe2   :  { %v233_v33 = vpop.f32.mrf.mxu0 }
  0xe3   :  { %v234_v35 = vadd.f32 %v233_v33, %v1734_v31 }
  0xe4   :  { %v235_v37 = vpop.f32.mrf.mxu0  ;;  %v274_v45 = vpop.f32.mrf.mxu1 }
  0xe5   :  { %v283_v38 = vadd.f32 %v280_v34, %v234_v35  ;;  %v236_v41 = vadd.f32 %v235_v37, %v1740_v36  ;;  %v275_v56 = vadd.f32 %v274_v45, %v1746_v53 }
  0xe6   :  { %v237_v39 = vpop.f32.mrf.mxu0  ;;  %v1245_v46 = vpop.f32.mrf.mxu1 }
  0xe7   :  { %v1111_v40 = vmul.f32 -1.442695, %v283_v38  ;;  %v290_v44 = vadd.f32 %v281_v42, %v236_v41 }
  0xe8   :  { %v238_v43 = vpop.f32.mrf.mxu0  ;;  %v277_v48 = vpop.f32.mrf.mxu1 }
  0xe9   :  { %1423 = vpow2.f32 %v1111_v40  ;;  %v1112_v47 = vmul.f32 -1.442695, %v290_v44  ;;  %v1114_v43 = vld [vmem:[%s2130_s0 + $0x20] sm:$0xff] }
  0xea   :  { %v1246_v49 = vpop.f32.mrf.mxu1 }
  0xeb   :  { %1425 = vpow2.f32 %v1112_v47 }
  0xf6   :  { %v1424_v50 = vpop.eup %1423 }
  0xf7   :  { %v287_v51 = vadd.f32 1.0, %v1424_v50 }
  0xf8   :  { %v1426_v54 = vpop.eup %1425 }
  0xf9   :  { %1427 = vrcp.f32 %v287_v51  ;;  %v294_v55 = vadd.f32 1.0, %v1426_v54 }
  0xfb   :  { %1429 = vrcp.f32 %v294_v55  ;;  %v1115_v55 = vld [vmem:[%s2130_s0 + $0x28] sm:$0xff] }
 0x106   :  { %v1428_v57 = vpop.eup %1427 }
 0x107   :  { %v297_v59 = vmul.f32 %v1428_v57, %v275_v56 }
 0x108   :  { %v1430_v61 = vpop.eup %1429 }
 0x109   :  { %v298_v60 = vadd.f32 %v297_v59, %v282_v58  ;;  %v300_v62 = vsub.f32 1.0, %v1430_v61  ;;  %v302_v27 = vmul.f32 0.0, %v1430_v61 }
 0x10b   :  { %1431 = vtanh.f32 %v298_v60 }
 0x118   :  { %v1432_v63 = vpop.eup %1431 }
 0x119   :  { %v301_v25 = vmul.f32 %v1432_v63, %v300_v62 }
 0x11b   :  { %v1752_v28 = vadd.f32 %v302_v27, %v301_v25 }
 0x11d   :  { %305 = vst [vmem:[%s2131_s3] sm:$0xff] %v1752_v28  ;;  %v307_v29 = vpack.c.bf16 %v1752_v28, %v1752_v28 }
 0x11f   :  { %341 = vmatmul.mubr.bf16.vlgmr.msra.gmra.mxu0 %v307_v29  ;;  %1264 = vmatmul.mubr.bf16.vlgmr.msra.gmra.mxu1 %v307_v29 }
 0x120   :  { %420 = vmatpush1.bf16.msra.mxu0 %v1549_v3  ;;  %1268 = vmatpush3.bf16.msra.mxu1 %v1592_v10 }
 0x121   :  { %421 = vmatprep.subr.bf16.mxu0 %v1557_v4  ;;  %1269 = vmatprep.subr.bf16.mxu1 %v1515_v1 }
 0x122   :  { %451 = vmatprep.mubr.bf16.mxu0 %v1516_v2  ;;  %1283 = vmatprep.mubr.msk.bf16.mxu1 %vm1517_vm0, %v1515_v1 }
 0x124   :  { %422 = vmatpush1.bf16.msra.mxu0 %v1563_v5  ;;  %1270 = vmatpush3.bf16.msra.mxu1 %v1604_v12 }
 0x125   :  { %423 = vmatprep.subr.bf16.mxu0 %v1569_v6  ;;  %1271 = vmatprep.subr.bf16.mxu1 %v1515_v1 }
 0x128   :  { %424 = vmatpush1.bf16.msra.mxu0 %v1575_v7  ;;  %1272 = vmatpush3.bf16.msra.mxu1 %v1623_v15 }
 0x129   :  { %425 = vmatprep.subr.bf16.mxu0 %v1581_v8  ;;  %1273 = vmatprep.subr.bf16.mxu1 %v1515_v1 }
 0x12c   :  { %426 = vmatpush1.bf16.msra.mxu0 %v1586_v9  ;;  %1274 = vmatpush3.bf16.msra.mxu1 %v1642_v18 }
 0x12d   :  { %427 = vmatprep.subr.bf16.mxu0 %v1598_v11  ;;  %1275 = vmatprep.subr.bf16.mxu1 %v1515_v1 }
 0x130   :  { %428 = vmatpush1.bf16.msra.mxu0 %v1611_v13  ;;  %1276 = vmatpush3.bf16.msra.mxu1 %v1661_v21 }
 0x131   :  { %429 = vmatprep.subr.bf16.mxu0 %v1617_v14  ;;  %1277 = vmatprep.subr.bf16.mxu1 %v1515_v1 }
 0x134   :  { %430 = vmatpush1.bf16.msra.mxu0 %v1630_v16  ;;  %1278 = vmatpush3.bf16.msra.mxu1 %v1675_v23 }
 0x135   :  { %431 = vmatprep.subr.bf16.mxu0 %v1636_v17  ;;  %1279 = vmatprep.subr.bf16.mxu1 %v1515_v1 }
 0x138   :  { %432 = vmatpush1.bf16.msra.mxu0 %v1649_v19  ;;  %1280 = vmatpush3.bf16.msra.mxu1 %v1684_v24 }
 0x139   :  { %433 = vmatprep.subr.bf16.mxu0 %v1655_v20  ;;  %1281 = vmatprep.subr.bf16.mxu1 %v1515_v1 }
 0x13c   :  { %434 = vmatpush1.bf16.msra.mxu0 %v1668_v22  ;;  %1282 = vmatpush3.bf16.msra.mxu1 %v1694_v26 }
 0x13d   :  { %530 = vmatprep.subr.bf16.mxu0 %v1542_v0  ;;  %1287 = vmatprep.subr.bf16.mxu1 %v1515_v1 }
 0x1df   :  { %v342_v30 = vpop.f32.mrf.mxu0  ;;  %v383_v33 = vpop.f32.mrf.mxu1 }
 0x1e0   :  { %v343_v34 = vadd.f32 %v342_v30, %v1734_v31  ;;  %v384_v52 = vadd.f32 %v383_v33, %v1746_v53 }
 0x1e1   :  { %v344_v35 = vpop.f32.mrf.mxu0  ;;  %v1265_v37 = vpop.f32.mrf.mxu1 }
 0x1e2   :  { %v393_v38 = vadd.f32 %v1113_v32, %v343_v34  ;;  %v345_v42 = vadd.f32 %v344_v35, %v1740_v36 }
 0x1e3   :  { %v346_v39 = vpop.f32.mrf.mxu0  ;;  %v386_v40 = vpop.f32.mrf.mxu1 }
 0x1e4   :  { %v1116_v41 = vmul.f32 -1.442695, %v393_v38  ;;  %v400_v46 = vadd.f32 %v1114_v43, %v345_v42  ;;  %v1120_v40 = vld [vmem:[%s2130_s0 + $0x38] sm:$0xff] }
 0x1e5   :  { %v347_v44 = vpop.f32.mrf.mxu0  ;;  %v1266_v45 = vpop.f32.mrf.mxu1 }
 0x1e6   :  { %1433 = vpow2.f32 %v1116_v41  ;;  %v1117_v47 = vmul.f32 -1.442695, %v400_v46 }
 0x1e8   :  { %1435 = vpow2.f32 %v1117_v47 }
 0x1f3   :  { %v1434_v48 = vpop.eup %1433 }
 0x1f4   :  { %v397_v49 = vadd.f32 1.0, %v1434_v48 }
 0x1f5   :  { %v1436_v50 = vpop.eup %1435 }
 0x1f6   :  { %1437 = vrcp.f32 %v397_v49  ;;  %v404_v51 = vadd.f32 1.0, %v1436_v50 }
 0x1f8   :  { %1439 = vrcp.f32 %v404_v51  ;;  %v1121_v51 = vld [vmem:[%s2130_s0 + $0x40] sm:$0xff] }
 0x203   :  { %v1438_v54 = vpop.eup %1437 }
 0x204   :  { %v407_v56 = vmul.f32 %v1438_v54, %v384_v52 }
 0x205   :  { %v1440_v58 = vpop.eup %1439 }
 0x206   :  { %v408_v57 = vadd.f32 %v1115_v55, %v407_v56  ;;  %v410_v59 = vsub.f32 1.0, %v1440_v58  ;;  %v412_v62 = vmul.f32 %v1440_v58, %v1752_v28  ;;  %v1119_v28 = vld [vmem:[%s2130_s0 + $0x30] sm:$0xff] }
 0x208   :  { %1441 = vtanh.f32 %v408_v57 }
 0x215   :  { %v1442_v60 = vpop.eup %1441 }
 0x216   :  { %v411_v61 = vmul.f32 %v1442_v60, %v410_v59 }
 0x218   :  { %v1808_v63 = vadd.f32 %v412_v62, %v411_v61 }
 0x21a   :  { %1118 = vst [vmem:[%s2131_s3 + $0x8] sm:$0xff] %v1808_v63  ;;  %v418_v25 = vpack.c.bf16 %v1808_v63, %v1808_v63 }
 0x21c   :  { %452 = vmatmul.mubr.bf16.vlgmr.msra.gmra.mxu0 %v418_v25  ;;  %1284 = vmatmul.mubr.bf16.vlgmr.msra.gmra.mxu1 %v418_v25 }
 0x21d   :  { %531 = vmatpush1.bf16.msra.mxu0 %v1549_v3  ;;  %1288 = vmatpush3.bf16.msra.mxu1 %v1592_v10 }
 0x21e   :  { %532 = vmatprep.subr.bf16.mxu0 %v1557_v4  ;;  %1289 = vmatprep.subr.bf16.mxu1 %v1515_v1 }
 0x21f   :  { %562 = vmatprep.mubr.bf16.mxu0 %v1516_v2  ;;  %1303 = vmatprep.mubr.msk.bf16.mxu1 %vm1517_vm0, %v1515_v1 }
 0x221   :  { %533 = vmatpush1.bf16.msra.mxu0 %v1563_v5  ;;  %1290 = vmatpush3.bf16.msra.mxu1 %v1604_v12 }
 0x222   :  { %534 = vmatprep.subr.bf16.mxu0 %v1569_v6  ;;  %1291 = vmatprep.subr.bf16.mxu1 %v1515_v1 }
 0x225   :  { %535 = vmatpush1.bf16.msra.mxu0 %v1575_v7  ;;  %1292 = vmatpush3.bf16.msra.mxu1 %v1623_v15 }
 0x226   :  { %536 = vmatprep.subr.bf16.mxu0 %v1581_v8  ;;  %1293 = vmatprep.subr.bf16.mxu1 %v1515_v1 }
 0x229   :  { %537 = vmatpush1.bf16.msra.mxu0 %v1586_v9  ;;  %1294 = vmatpush3.bf16.msra.mxu1 %v1642_v18 }
 0x22a   :  { %538 = vmatprep.subr.bf16.mxu0 %v1598_v11  ;;  %1295 = vmatprep.subr.bf16.mxu1 %v1515_v1 }
 0x22d   :  { %539 = vmatpush1.bf16.msra.mxu0 %v1611_v13  ;;  %1296 = vmatpush3.bf16.msra.mxu1 %v1661_v21 }
 0x22e   :  { %540 = vmatprep.subr.bf16.mxu0 %v1617_v14  ;;  %1297 = vmatprep.subr.bf16.mxu1 %v1515_v1 }
 0x231   :  { %541 = vmatpush1.bf16.msra.mxu0 %v1630_v16  ;;  %1298 = vmatpush3.bf16.msra.mxu1 %v1675_v23 }
 0x232   :  { %542 = vmatprep.subr.bf16.mxu0 %v1636_v17  ;;  %1299 = vmatprep.subr.bf16.mxu1 %v1515_v1 }
 0x235   :  { %543 = vmatpush1.bf16.msra.mxu0 %v1649_v19  ;;  %1300 = vmatpush3.bf16.msra.mxu1 %v1684_v24 }
 0x236   :  { %544 = vmatprep.subr.bf16.mxu0 %v1655_v20  ;;  %1301 = vmatprep.subr.bf16.mxu1 %v1515_v1 }
 0x239   :  { %545 = vmatpush1.bf16.msra.mxu0 %v1668_v22  ;;  %1302 = vmatpush3.bf16.msra.mxu1 %v1694_v26 }
 0x23a   :  { %641 = vmatprep.subr.bf16.mxu0 %v1542_v0  ;;  %1307 = vmatprep.subr.bf16.mxu1 %v1515_v1 }
 0x2dc   :  { %v453_v27 = vpop.f32.mrf.mxu0  ;;  %v494_v29 = vpop.f32.mrf.mxu1 }
 0x2dd   :  { %v454_v30 = vadd.f32 %v453_v27, %v1734_v31  ;;  %v495_v49 = vadd.f32 %v494_v29, %v1746_v53 }
 0x2de   :  { %v455_v32 = vpop.f32.mrf.mxu0  ;;  %v1285_v33 = vpop.f32.mrf.mxu1 }
 0x2df   :  { %v504_v34 = vadd.f32 %v1119_v28, %v454_v30  ;;  %v456_v39 = vadd.f32 %v455_v32, %v1740_v36 }
 0x2e0   :  { %v457_v35 = vpop.f32.mrf.mxu0  ;;  %v497_v37 = vpop.f32.mrf.mxu1 }
 0x2e1   :  { %v1122_v38 = vmul.f32 -1.442695, %v504_v34  ;;  %v511_v43 = vadd.f32 %v1120_v40, %v456_v39  ;;  %v1126_v37 = vld [vmem:[%s2130_s0 + $0x50] sm:$0xff] }
 0x2e2   :  { %v458_v41 = vpop.f32.mrf.mxu0  ;;  %v1286_v42 = vpop.f32.mrf.mxu1 }
 0x2e3   :  { %1443 = vpow2.f32 %v1122_v38  ;;  %v1123_v44 = vmul.f32 -1.442695, %v511_v43 }
 0x2e5   :  { %1445 = vpow2.f32 %v1123_v44 }
 0x2f0   :  { %v1444_v45 = vpop.eup %1443 }
 0x2f1   :  { %v508_v46 = vadd.f32 1.0, %v1444_v45 }
 0x2f2   :  { %v1446_v47 = vpop.eup %1445 }
 0x2f3   :  { %1447 = vrcp.f32 %v508_v46  ;;  %v515_v48 = vadd.f32 1.0, %v1446_v47 }
 0x2f5   :  { %1449 = vrcp.f32 %v515_v48  ;;  %v1127_v48 = vld [vmem:[%s2130_s0 + $0x58] sm:$0xff] }
 0x300   :  { %v1448_v50 = vpop.eup %1447 }
 0x301   :  { %v518_v52 = vmul.f32 %v1448_v50, %v495_v49 }
 0x302   :  { %v1450_v55 = vpop.eup %1449 }
 0x303   :  { %v519_v54 = vadd.f32 %v1121_v51, %v518_v52  ;;  %v521_v56 = vsub.f32 1.0, %v1450_v55  ;;  %v523_v59 = vmul.f32 %v1450_v55, %v1808_v63  ;;  %v1125_v63 = vld [vmem:[%s2130_s0 + $0x48] sm:$0xff] }
 0x305   :  { %1451 = vtanh.f32 %v519_v54 }
 0x312   :  { %v1452_v57 = vpop.eup %1451 }
 0x313   :  { %v522_v58 = vmul.f32 %v1452_v57, %v521_v56 }
 0x315   :  { %v1864_v60 = vadd.f32 %v523_v59, %v522_v58 }
 0x317   :  { %1124 = vst [vmem:[%s2131_s3 + $0x10] sm:$0xff] %v1864_v60  ;;  %v529_v61 = vpack.c.bf16 %v1864_v60, %v1864_v60 }
 0x319   :  { %563 = vmatmul.mubr.bf16.vlgmr.msra.gmra.mxu0 %v529_v61  ;;  %1304 = vmatmul.mubr.bf16.vlgmr.msra.gmra.mxu1 %v529_v61 }
 0x31a   :  { %642 = vmatpush1.bf16.msra.mxu0 %v1549_v3  ;;  %1308 = vmatpush3.bf16.msra.mxu1 %v1592_v10 }
 0x31b   :  { %643 = vmatprep.subr.bf16.mxu0 %v1557_v4  ;;  %1309 = vmatprep.subr.bf16.mxu1 %v1515_v1 }
 0x31c   :  { %673 = vmatprep.mubr.bf16.mxu0 %v1516_v2  ;;  %1323 = vmatprep.mubr.msk.bf16.mxu1 %vm1517_vm0, %v1515_v1 }
 0x31e   :  { %644 = vmatpush1.bf16.msra.mxu0 %v1563_v5  ;;  %1310 = vmatpush3.bf16.msra.mxu1 %v1604_v12 }
 0x31f   :  { %645 = vmatprep.subr.bf16.mxu0 %v1569_v6  ;;  %1311 = vmatprep.subr.bf16.mxu1 %v1515_v1 }
 0x322   :  { %646 = vmatpush1.bf16.msra.mxu0 %v1575_v7  ;;  %1312 = vmatpush3.bf16.msra.mxu1 %v1623_v15 }
 0x323   :  { %647 = vmatprep.subr.bf16.mxu0 %v1581_v8  ;;  %1313 = vmatprep.subr.bf16.mxu1 %v1515_v1 }
 0x326   :  { %648 = vmatpush1.bf16.msra.mxu0 %v1586_v9  ;;  %1314 = vmatpush3.bf16.msra.mxu1 %v1642_v18 }
 0x327   :  { %649 = vmatprep.subr.bf16.mxu0 %v1598_v11  ;;  %1315 = vmatprep.subr.bf16.mxu1 %v1515_v1 }
 0x32a   :  { %650 = vmatpush1.bf16.msra.mxu0 %v1611_v13  ;;  %1316 = vmatpush3.bf16.msra.mxu1 %v1661_v21 }
 0x32b   :  { %651 = vmatprep.subr.bf16.mxu0 %v1617_v14  ;;  %1317 = vmatprep.subr.bf16.mxu1 %v1515_v1 }
 0x32e   :  { %652 = vmatpush1.bf16.msra.mxu0 %v1630_v16  ;;  %1318 = vmatpush3.bf16.msra.mxu1 %v1675_v23 }
 0x32f   :  { %653 = vmatprep.subr.bf16.mxu0 %v1636_v17  ;;  %1319 = vmatprep.subr.bf16.mxu1 %v1515_v1 }
 0x332   :  { %654 = vmatpush1.bf16.msra.mxu0 %v1649_v19  ;;  %1320 = vmatpush3.bf16.msra.mxu1 %v1684_v24 }
 0x333   :  { %655 = vmatprep.subr.bf16.mxu0 %v1655_v20  ;;  %1321 = vmatprep.subr.bf16.mxu1 %v1515_v1 }
 0x336   :  { %656 = vmatpush1.bf16.msra.mxu0 %v1668_v22  ;;  %1322 = vmatpush3.bf16.msra.mxu1 %v1694_v26 }
 0x337   :  { %752 = vmatprep.subr.bf16.mxu0 %v1542_v0  ;;  %1327 = vmatprep.subr.bf16.mxu1 %v1515_v1 }
 0x3d9   :  { %v564_v62 = vpop.f32.mrf.mxu0  ;;  %v605_v25 = vpop.f32.mrf.mxu1 }
 0x3da   :  { %v565_v27 = vadd.f32 %v564_v62, %v1734_v31  ;;  %v606_v46 = vadd.f32 %v605_v25, %v1746_v53 }
 0x3db   :  { %v566_v28 = vpop.f32.mrf.mxu0  ;;  %v1305_v29 = vpop.f32.mrf.mxu1 }
 0x3dc   :  { %v615_v30 = vadd.f32 %v1125_v63, %v565_v27  ;;  %v567_v35 = vadd.f32 %v566_v28, %v1740_v36 }
 0x3dd   :  { %v568_v32 = vpop.f32.mrf.mxu0  ;;  %v608_v33 = vpop.f32.mrf.mxu1 }
 0x3de   :  { %v1128_v34 = vmul.f32 -1.442695, %v615_v30  ;;  %v622_v40 = vadd.f32 %v1126_v37, %v567_v35  ;;  %v1132_v33 = vld [vmem:[%s2130_s0 + $0x68] sm:$0xff] }
 0x3df   :  { %v569_v38 = vpop.f32.mrf.mxu0  ;;  %v1306_v39 = vpop.f32.mrf.mxu1 }
 0x3e0   :  { %1453 = vpow2.f32 %v1128_v34  ;;  %v1129_v41 = vmul.f32 -1.442695, %v622_v40 }
 0x3e2   :  { %1455 = vpow2.f32 %v1129_v41 }
 0x3ed   :  { %v1454_v42 = vpop.eup %1453 }
 0x3ee   :  { %v619_v43 = vadd.f32 1.0, %v1454_v42 }
 0x3ef   :  { %v1456_v44 = vpop.eup %1455 }
 0x3f0   :  { %1457 = vrcp.f32 %v619_v43  ;;  %v626_v45 = vadd.f32 1.0, %v1456_v44 }
 0x3f2   :  { %1459 = vrcp.f32 %v626_v45  ;;  %v1133_v45 = vld [vmem:[%s2130_s0 + $0x70] sm:$0xff] }
 0x3fd   :  { %v1458_v47 = vpop.eup %1457 }
 0x3fe   :  { %v629_v49 = vmul.f32 %v1458_v47, %v606_v46 }
 0x3ff   :  { %v1460_v51 = vpop.eup %1459 }
 0x400   :  { %v630_v50 = vadd.f32 %v1127_v48, %v629_v49  ;;  %v632_v52 = vsub.f32 1.0, %v1460_v51  ;;  %v634_v56 = vmul.f32 %v1460_v51, %v1864_v60  ;;  %v1131_v60 = vld [vmem:[%s2130_s0 + $0x60] sm:$0xff] }
 0x402   :  { %1461 = vtanh.f32 %v630_v50 }
 0x40f   :  { %v1462_v54 = vpop.eup %1461 }
 0x410   :  { %v633_v55 = vmul.f32 %v1462_v54, %v632_v52 }
 0x412   :  { %v1920_v57 = vadd.f32 %v634_v56, %v633_v55 }
 0x414   :  { %1130 = vst [vmem:[%s2131_s3 + $0x18] sm:$0xff] %v1920_v57  ;;  %v640_v58 = vpack.c.bf16 %v1920_v57, %v1920_v57 }
 0x416   :  { %674 = vmatmul.mubr.bf16.vlgmr.msra.gmra.mxu0 %v640_v58  ;;  %1324 = vmatmul.mubr.bf16.vlgmr.msra.gmra.mxu1 %v640_v58 }
 0x417   :  { %753 = vmatpush1.bf16.msra.mxu0 %v1549_v3  ;;  %1328 = vmatpush3.bf16.msra.mxu1 %v1592_v10 }
 0x418   :  { %754 = vmatprep.subr.bf16.mxu0 %v1557_v4  ;;  %1329 = vmatprep.subr.bf16.mxu1 %v1515_v1 }
 0x419   :  { %784 = vmatprep.mubr.bf16.mxu0 %v1516_v2  ;;  %1343 = vmatprep.mubr.msk.bf16.mxu1 %vm1517_vm0, %v1515_v1 }
 0x41b   :  { %755 = vmatpush1.bf16.msra.mxu0 %v1563_v5  ;;  %1330 = vmatpush3.bf16.msra.mxu1 %v1604_v12 }
 0x41c   :  { %756 = vmatprep.subr.bf16.mxu0 %v1569_v6  ;;  %1331 = vmatprep.subr.bf16.mxu1 %v1515_v1 }
 0x41f   :  { %757 = vmatpush1.bf16.msra.mxu0 %v1575_v7  ;;  %1332 = vmatpush3.bf16.msra.mxu1 %v1623_v15 }
 0x420   :  { %758 = vmatprep.subr.bf16.mxu0 %v1581_v8  ;;  %1333 = vmatprep.subr.bf16.mxu1 %v1515_v1 }
 0x423   :  { %759 = vmatpush1.bf16.msra.mxu0 %v1586_v9  ;;  %1334 = vmatpush3.bf16.msra.mxu1 %v1642_v18 }
 0x424   :  { %760 = vmatprep.subr.bf16.mxu0 %v1598_v11  ;;  %1335 = vmatprep.subr.bf16.mxu1 %v1515_v1 }
 0x427   :  { %761 = vmatpush1.bf16.msra.mxu0 %v1611_v13  ;;  %1336 = vmatpush3.bf16.msra.mxu1 %v1661_v21 }
 0x428   :  { %762 = vmatprep.subr.bf16.mxu0 %v1617_v14  ;;  %1337 = vmatprep.subr.bf16.mxu1 %v1515_v1 }
 0x42b   :  { %763 = vmatpush1.bf16.msra.mxu0 %v1630_v16  ;;  %1338 = vmatpush3.bf16.msra.mxu1 %v1675_v23 }
 0x42c   :  { %764 = vmatprep.subr.bf16.mxu0 %v1636_v17  ;;  %1339 = vmatprep.subr.bf16.mxu1 %v1515_v1 }
 0x42f   :  { %765 = vmatpush1.bf16.msra.mxu0 %v1649_v19  ;;  %1340 = vmatpush3.bf16.msra.mxu1 %v1684_v24 }
 0x430   :  { %766 = vmatprep.subr.bf16.mxu0 %v1655_v20  ;;  %1341 = vmatprep.subr.bf16.mxu1 %v1515_v1 }
 0x433   :  { %767 = vmatpush1.bf16.msra.mxu0 %v1668_v22  ;;  %1342 = vmatpush3.bf16.msra.mxu1 %v1694_v26 }
 0x434   :  { %863 = vmatprep.subr.bf16.mxu0 %v1542_v0  ;;  %1347 = vmatprep.subr.bf16.mxu1 %v1515_v1 }
 0x4d6   :  { %v675_v59 = vpop.f32.mrf.mxu0  ;;  %v716_v61 = vpop.f32.mrf.mxu1 }
 0x4d7   :  { %v676_v62 = vadd.f32 %v675_v59, %v1734_v31  ;;  %v717_v43 = vadd.f32 %v716_v61, %v1746_v53 }
 0x4d8   :  { %v677_v63 = vpop.f32.mrf.mxu0  ;;  %v1325_v25 = vpop.f32.mrf.mxu1 }
 0x4d9   :  { %v726_v27 = vadd.f32 %v1131_v60, %v676_v62  ;;  %v678_v32 = vadd.f32 %v677_v63, %v1740_v36 }
 0x4da   :  { %v679_v28 = vpop.f32.mrf.mxu0  ;;  %v719_v29 = vpop.f32.mrf.mxu1 }
 0x4db   :  { %v1134_v30 = vmul.f32 -1.442695, %v726_v27  ;;  %v733_v37 = vadd.f32 %v1132_v33, %v678_v32  ;;  %v1139_v27 = vld [vmem:[%s2130_s0 + $0x88] sm:$0xff] }
 0x4dc   :  { %v680_v34 = vpop.f32.mrf.mxu0  ;;  %v1326_v35 = vpop.f32.mrf.mxu1 }
 0x4dd   :  { %1463 = vpow2.f32 %v1134_v30  ;;  %v1135_v38 = vmul.f32 -1.442695, %v733_v37 }
 0x4df   :  { %1465 = vpow2.f32 %v1135_v38 }
 0x4ea   :  { %v1464_v39 = vpop.eup %1463 }
 0x4eb   :  { %v730_v40 = vadd.f32 1.0, %v1464_v39  ;;  %v1503_v39 = vld [vmem:[%s2128_s1 + $0xa8] ss:$12 sps:$4 sm:$0xff]  }
 0x4ec   :  { %v1466_v41 = vpop.eup %1465 }
 0x4ed   :  { %1467 = vrcp.f32 %v730_v40  ;;  %v737_v42 = vadd.f32 1.0, %v1466_v41  ;;  %v1504_v40 = vld [vmem:[%s2128_s1 + $0xb0] ss:$12 sps:$4 sm:$0xff]   ;;  %v1505_v41 = vld [vmem:[%s2128_s1 + $0x94] ss:$12 sps:$4 sm:$0xff]  }
 0x4ef   :  { %1469 = vrcp.f32 %v737_v42  ;;  %v1506_v42 = vld [vmem:[%s2128_s1 + $0x90] ss:$12 sps:$4 sm:$0xff]  }
 0x4fa   :  { %v1468_v44 = vpop.eup %1467 }
 0x4fb   :  { %v740_v46 = vmul.f32 %v1468_v44, %v717_v43  ;;  %v1507_v43 = vld [vmem:[%s2128_s1 + $0x98] ss:$12 sps:$4 sm:$0xff]   ;;  %v1508_v44 = vld [vmem:[%s2128_s1 + $0x7c] ss:$12 sps:$4 sm:$0xff]  }
 0x4fc   :  { %v1470_v48 = vpop.eup %1469 }
 0x4fd   :  { %v741_v47 = vadd.f32 %v1133_v45, %v740_v46  ;;  %v743_v49 = vsub.f32 1.0, %v1470_v48  ;;  %v745_v52 = vmul.f32 %v1470_v48, %v1920_v57  ;;  %v1510_v45 = vld [vmem:[%s2128_s1 + $0x64] ss:$12 sps:$4 sm:$0xff]   ;;  %v1511_v46 = vld [vmem:[%s2128_s1 + $0x60] ss:$12 sps:$4 sm:$0xff]  }
 0x4fe   :  { %v1514_v48 = vld [vmem:[%s2128_s1 + $0x34] ss:$12 sps:$4 sm:$0xff]  }
 0x4ff   :  { %1471 = vtanh.f32 %v741_v47  ;;  %v1512_v47 = vld [vmem:[%s2128_s1 + $0x4c] ss:$12 sps:$4 sm:$0xff]  }
 0x50c   :  { %v1472_v50 = vpop.eup %1471 }
 0x50d   :  { %v744_v51 = vmul.f32 %v1472_v50, %v743_v49 }
 0x50f   :  { %v1976_v54 = vadd.f32 %v745_v52, %v744_v51 }
 0x511   :  { %1136 = vst [vmem:[%s2131_s3 + $0x20] sm:$0xff] %v1976_v54  ;;  %v751_v55 = vpack.c.bf16 %v1976_v54, %v1976_v54 }
 0x513   :  { %785 = vmatmul.mubr.bf16.vlgmr.msra.gmra.mxu0 %v751_v55  ;;  %1344 = vmatmul.mubr.bf16.vlgmr.msra.gmra.mxu1 %v751_v55 }
 0x514   :  { %864 = vmatpush1.bf16.msra.mxu0 %v1549_v3  ;;  %1348 = vmatpush3.bf16.msra.mxu1 %v1592_v10 }
 0x515   :  { %865 = vmatprep.subr.bf16.mxu0 %v1557_v4  ;;  %1349 = vmatprep.subr.bf16.mxu1 %v1515_v1  ;;  %v1137_v4 = vld [vmem:[%s2130_s0 + $0x78] sm:$0xff] }
 0x516   :  { %895 = vmatprep.mubr.bf16.mxu0 %v1516_v2  ;;  %1363 = vmatprep.mubr.msk.bf16.mxu1 %vm1517_vm0, %v1515_v1 }
 0x518   :  { %866 = vmatpush1.bf16.msra.mxu0 %v1563_v5  ;;  %1350 = vmatpush3.bf16.msra.mxu1 %v1604_v12 }
 0x519   :  { %867 = vmatprep.subr.bf16.mxu0 %v1569_v6  ;;  %1351 = vmatprep.subr.bf16.mxu1 %v1515_v1 }
 0x51c   :  { %868 = vmatpush1.bf16.msra.mxu0 %v1575_v7  ;;  %1352 = vmatpush3.bf16.msra.mxu1 %v1623_v15 }
 0x51d   :  { %869 = vmatprep.subr.bf16.mxu0 %v1581_v8  ;;  %1353 = vmatprep.subr.bf16.mxu1 %v1515_v1 }
 0x520   :  { %870 = vmatpush1.bf16.msra.mxu0 %v1586_v9  ;;  %1354 = vmatpush3.bf16.msra.mxu1 %v1642_v18 }
 0x521   :  { %871 = vmatprep.subr.bf16.mxu0 %v1598_v11  ;;  %1355 = vmatprep.subr.bf16.mxu1 %v1515_v1 }
 0x524   :  { %872 = vmatpush1.bf16.msra.mxu0 %v1611_v13  ;;  %1356 = vmatpush3.bf16.msra.mxu1 %v1661_v21 }
 0x525   :  { %873 = vmatprep.subr.bf16.mxu0 %v1617_v14  ;;  %1357 = vmatprep.subr.bf16.mxu1 %v1515_v1 }
 0x528   :  { %874 = vmatpush1.bf16.msra.mxu0 %v1630_v16  ;;  %1358 = vmatpush3.bf16.msra.mxu1 %v1675_v23 }
 0x529   :  { %875 = vmatprep.subr.bf16.mxu0 %v1636_v17  ;;  %1359 = vmatprep.subr.bf16.mxu1 %v1515_v1 }
 0x52c   :  { %876 = vmatpush1.bf16.msra.mxu0 %v1649_v19  ;;  %1360 = vmatpush3.bf16.msra.mxu1 %v1684_v24 }
 0x52d   :  { %877 = vmatprep.subr.bf16.mxu0 %v1655_v20  ;;  %1361 = vmatprep.subr.bf16.mxu1 %v1515_v1 }
 0x530   :  { %878 = vmatpush1.bf16.msra.mxu0 %v1668_v22  ;;  %1362 = vmatpush3.bf16.msra.mxu1 %v1694_v26 }
 0x531   :  { %974 = vmatprep.subr.bf16.mxu0 %v1542_v0  ;;  %1367 = vmatprep.subr.bf16.mxu1 %v1515_v1  ;;  %v1138_v0 = vld [vmem:[%s2130_s0 + $0x80] sm:$0xff] }
 0x5d3   :  { %v786_v3 = vpop.f32.mrf.mxu0  ;;  %v827_v5 = vpop.f32.mrf.mxu1 }
 0x5d4   :  { %v787_v6 = vadd.f32 %v786_v3, %v1734_v31  ;;  %v828_v63 = vadd.f32 %v827_v5, %v1746_v53 }
 0x5d5   :  { %v788_v7 = vpop.f32.mrf.mxu0  ;;  %v1345_v8 = vpop.f32.mrf.mxu1 }
 0x5d6   :  { %v837_v9 = vadd.f32 %v1137_v4, %v787_v6  ;;  %v789_v13 = vadd.f32 %v788_v7, %v1740_v36  ;;  %v1145_v8 = vld [vmem:[%s2130_s0 + $0xa0] sm:$0xff] }
 0x5d7   :  { %v790_v10 = vpop.f32.mrf.mxu0  ;;  %v830_v11 = vpop.f32.mrf.mxu1 }
 0x5d8   :  { %v1140_v12 = vmul.f32 -1.442695, %v837_v9  ;;  %v844_v57 = vadd.f32 %v1138_v0, %v789_v13 }
 0x5d9   :  { %v791_v14 = vpop.f32.mrf.mxu0  ;;  %v1346_v56 = vpop.f32.mrf.mxu1 }
 0x5da   :  { %1473 = vpow2.f32 %v1140_v12  ;;  %v1141_v58 = vmul.f32 -1.442695, %v844_v57 }
 0x5dc   :  { %1475 = vpow2.f32 %v1141_v58 }
 0x5e7   :  { %v1474_v59 = vpop.eup %1473 }
 0x5e8   :  { %v841_v60 = vadd.f32 1.0, %v1474_v59  ;;  %v1149_v59 = vld [vmem:[%s2130_s0 + $0xa8] sm:$0xff] }
 0x5e9   :  { %v1476_v61 = vpop.eup %1475 }
 0x5ea   :  { %1477 = vrcp.f32 %v841_v60  ;;  %v848_v62 = vadd.f32 1.0, %v1476_v61 }
 0x5ec   :  { %1479 = vrcp.f32 %v848_v62 }
 0x5f7   :  { %v1478_v25 = vpop.eup %1477 }
 0x5f8   :  { %v851_v28 = vmul.f32 %v1478_v25, %v828_v63 }
 0x5f9   :  { %v1480_v30 = vpop.eup %1479 }
 0x5fa   :  { %v852_v29 = vadd.f32 %v1139_v27, %v851_v28  ;;  %v854_v32 = vsub.f32 1.0, %v1480_v30  ;;  %v856_v35 = vmul.f32 %v1480_v30, %v1976_v54 }
 0x5fc   :  { %1481 = vtanh.f32 %v852_v29 }
 0x609   :  { %v1482_v33 = vpop.eup %1481 }
 0x60a   :  { %v855_v34 = vmul.f32 %v1482_v33, %v854_v32  ;;  %v1150_v32 = vld [vmem:[%s2130_s0 + $0xb0] sm:$0xff] }
 0x60c   :  { %v2032_v37 = vadd.f32 %v856_v35, %v855_v34 }
 0x60e   :  { %1142 = vst [vmem:[%s2131_s3 + $0x28] sm:$0xff] %v2032_v37  ;;  %v862_v38 = vpack.c.bf16 %v2032_v37, %v2032_v37 }
 0x610   :  { %896 = vmatmul.mubr.bf16.vlgmr.msra.gmra.mxu0 %v862_v38  ;;  %1364 = vmatmul.mubr.bf16.vlgmr.msra.gmra.mxu1 %v862_v38 }
 0x611   :  { %975 = vmatpush1.bf16.msra.mxu0 %v1503_v39  ;;  %1368 = vmatpush3.bf16.msra.mxu1 %v1504_v40 }
 0x612   :  { %976 = vmatprep.subr.bf16.mxu0 %v1505_v41  ;;  %1369 = vmatprep.subr.bf16.mxu1 %v1515_v1 }
 0x613   :  { %1006 = vmatprep.mubr.bf16.mxu0 %v1516_v2  ;;  %1383 = vmatprep.mubr.msk.bf16.mxu1 %vm1517_vm0, %v1515_v1  ;;  %v1509_v2 = vld [vmem:[%s2128_s1 + $0x78] ss:$12 sps:$4 sm:$0xff]  }
 0x615   :  { %977 = vmatpush1.bf16.msra.mxu0 %v1506_v42  ;;  %1370 = vmatpush3.bf16.msra.mxu1 %v1507_v43 }
 0x616   :  { %978 = vmatprep.subr.bf16.mxu0 %v1508_v44  ;;  %1371 = vmatprep.subr.bf16.mxu1 %v1515_v1 }
 0x619   :  { %979 = vmatpush1.bf16.msra.mxu0 %v1509_v2  ;;  %1372 = vmatpush3.bf16.msra.mxu1 %v1623_v15  ;;  %v1513_v15 = vld [vmem:[%s2128_s1 + $0x48] ss:$12 sps:$4 sm:$0xff]  }
 0x61a   :  { %980 = vmatprep.subr.bf16.mxu0 %v1510_v45  ;;  %1373 = vmatprep.subr.bf16.mxu1 %v1515_v1 }
 0x61d   :  { %981 = vmatpush1.bf16.msra.mxu0 %v1511_v46  ;;  %1374 = vmatpush3.bf16.msra.mxu1 %v1642_v18 }
 0x61e   :  { %982 = vmatprep.subr.bf16.mxu0 %v1512_v47  ;;  %1375 = vmatprep.subr.bf16.mxu1 %v1515_v1 }
 0x621   :  { %983 = vmatpush1.bf16.msra.mxu0 %v1513_v15  ;;  %1376 = vmatpush3.bf16.msra.mxu1 %v1661_v21 }
 0x622   :  { %984 = vmatprep.subr.bf16.mxu0 %v1514_v48  ;;  %1377 = vmatprep.subr.bf16.mxu1 %v1515_v1 }
 0x625   :  { %985 = vmatpush1.bf16.msra.mxu0 %v1630_v16  ;;  %1378 = vmatpush3.bf16.msra.mxu1 %v1675_v23  ;;  %v1143_v16 = vld [vmem:[%s2130_s0 + $0x90] sm:$0xff] }
 0x626   :  { %986 = vmatprep.subr.bf16.mxu0 %v1636_v17  ;;  %1379 = vmatprep.subr.bf16.mxu1 %v1515_v1 }
 0x629   :  { %987 = vmatpush1.bf16.msra.mxu0 %v1649_v19  ;;  %1380 = vmatpush3.bf16.msra.mxu1 %v1684_v24 }
 0x62a   :  { %988 = vmatprep.subr.bf16.mxu0 %v1655_v20  ;;  %1381 = vmatprep.subr.bf16.mxu1 %v1515_v1 }
 0x62d   :  { %989 = vmatpush1.bf16.msra.mxu0 %v1668_v22  ;;  %1382 = vmatpush3.bf16.msra.mxu1 %v1694_v26  ;;  %v1144_v22 = vld [vmem:[%s2130_s0 + $0x98] sm:$0xff] }
 0x6d0   :  { %v897_v18 = vpop.f32.mrf.mxu0  ;;  %v938_v17 = vpop.f32.mrf.mxu1 }
 0x6d1   :  { %v898_v21 = vadd.f32 %v897_v18, %v1734_v31  ;;  %v939_v6 = vadd.f32 %v938_v17, %v1746_v53 }
 0x6d2   :  { %v899_v23 = vpop.f32.mrf.mxu0  ;;  %v1365_v19 = vpop.f32.mrf.mxu1 }
 0x6d3   :  { %v948_v49 = vadd.f32 %v1143_v16, %v898_v21  ;;  %v900_v1 = vadd.f32 %v899_v23, %v1740_v36 }
 0x6d4   :  { %v901_v24 = vpop.f32.mrf.mxu0  ;;  %v941_v50 = vpop.f32.mrf.mxu1 }
 0x6d5   :  { %v1146_v20 = vmul.f32 -1.442695, %v948_v49  ;;  %v955_v52 = vadd.f32 %v1144_v22, %v900_v1 }
 0x6d6   :  { %v902_v26 = vpop.f32.mrf.mxu0  ;;  %v1366_v51 = vpop.f32.mrf.mxu1 }
 0x6d7   :  { %1483 = vpow2.f32 %v1146_v20  ;;  %v1147_v54 = vmul.f32 -1.442695, %v955_v52 }
 0x6d9   :  { %1485 = vpow2.f32 %v1147_v54 }
 0x6e4   :  { %v1484_v55 = vpop.eup %1483 }
 0x6e5   :  { %v952_v3 = vadd.f32 1.0, %v1484_v55 }
 0x6e6   :  { %v1486_v4 = vpop.eup %1485 }
 0x6e7   :  { %1487 = vrcp.f32 %v952_v3  ;;  %v959_v5 = vadd.f32 1.0, %v1486_v4 }
 0x6e9   :  { %1489 = vrcp.f32 %v959_v5 }
 0x6f4   :  { %v1488_v7 = vpop.eup %1487 }
 0x6f5   :  { %v962_v9 = vmul.f32 %v1488_v7, %v939_v6 }
 0x6f6   :  { %v1490_v11 = vpop.eup %1489 }
 0x6f7   :  { %v963_v10 = vadd.f32 %v1145_v8, %v962_v9  ;;  %v965_v12 = vsub.f32 1.0, %v1490_v11  ;;  %v967_v14 = vmul.f32 %v1490_v11, %v2032_v37 }
 0x6f9   :  { %1491 = vtanh.f32 %v963_v10 }
 0x706   :  { %v1492_v13 = vpop.eup %1491 }
 0x707   :  { %v966_v0 = vmul.f32 %v1492_v13, %v965_v12 }
 0x709   :  { %v968_v56 = vadd.f32 %v967_v14, %v966_v0 }
 0x70b   :  { %1148 = vst [vmem:[%s2131_s3 + $0x30] sm:$0xff] %v968_v56  ;;  %v973_v57 = vpack.c.bf16 %v968_v56, %v968_v56 }
 0x70d   :  { %1007 = vmatmul.mubr.bf16.vlgmr.msra.gmra.mxu0 %v973_v57  ;;  %1384 = vmatmul.mubr.bf16.vlgmr.msra.gmra.mxu1 %v973_v57 }
 0x7cd   :  { %v1008_v58 = vpop.f32.mrf.mxu0  ;;  %v1049_v60 = vpop.f32.mrf.mxu1 }
 0x7ce   :  { %v1009_v61 = vadd.f32 %v1008_v58, %v1734_v31  ;;  %v1050_v41 = vadd.f32 %v1049_v60, %v1746_v53 }
 0x7cf   :  { %v1010_v62 = vpop.f32.mrf.mxu0  ;;  %v1385_v63 = vpop.f32.mrf.mxu1 }
 0x7d0   :  { %v1059_v25 = vadd.f32 %v1149_v59, %v1009_v61  ;;  %v1011_v30 = vadd.f32 %v1010_v62, %v1740_v36  ;;  %v1151_v36 = vld [vmem:[%s2130_s0 + $0xb8] sm:$0xff] }
 0x7d1   :  { %v1012_v27 = vpop.f32.mrf.mxu0  ;;  %v1052_v28 = vpop.f32.mrf.mxu1 }
 0x7d2   :  { %v1152_v29 = vmul.f32 -1.442695, %v1059_v25  ;;  %v1066_v35 = vadd.f32 %v1150_v32, %v1011_v30 }
 0x7d3   :  { %v1013_v33 = vpop.f32.mrf.mxu0  ;;  %v1386_v34 = vpop.f32.mrf.mxu1 }
 0x7d4   :  { %1493 = vpow2.f32 %v1152_v29  ;;  %v1153_v37 = vmul.f32 -1.442695, %v1066_v35 }
 0x7d6   :  { %1495 = vpow2.f32 %v1153_v37 }
 0x7e1   :  { %v1494_v38 = vpop.eup %1493 }
 0x7e2   :  { %v1063_v31 = vadd.f32 1.0, %v1494_v38 }
 0x7e3   :  { %v1496_v39 = vpop.eup %1495 }
 0x7e4   :  { %1497 = vrcp.f32 %v1063_v31  ;;  %v1070_v40 = vadd.f32 1.0, %v1496_v39 }
 0x7e6   :  { %1499 = vrcp.f32 %v1070_v40 }
 0x7f1   :  { %v1498_v42 = vpop.eup %1497 }
 0x7f2   :  { %v1073_v43 = vmul.f32 %v1498_v42, %v1050_v41 }
 0x7f3   :  { %v1500_v2 = vpop.eup %1499 }
 0x7f4   :  { %v1074_v44 = vadd.f32 %v1151_v36, %v1073_v43  ;;  %v1076_v45 = vsub.f32 1.0, %v1500_v2  ;;  %v1078_v15 = vmul.f32 %v1500_v2, %v968_v56 }
 0x7f6   :  { %1501 = vtanh.f32 %v1074_v44 }
 0x803   :  { %v1502_v46 = vpop.eup %1501 }
 0x804   :  { %v1077_v47 = vmul.f32 %v1502_v46, %v1076_v45 }
 0x806   :  { %v1079_v48 = vadd.f32 %v1078_v15, %v1077_v47 }
 0x808   :  { %1154 = vst [vmem:[%s2131_s3 + $0x38] sm:$0xff] %v1079_v48 }

</bundles_post_ra>
